<compile_context>
chip_gen: v6e
topology: v6e:2x2x1
jax: 0.10.0
libtpu: 0.0.40
codegen_flags: <defaults>
</compile_context>

<pallas_src>
import functools

import jax
import jax.numpy as jnp
from jax.experimental import pallas as pl
from jax.experimental.pallas import tpu as pltpu


def _fused_discriminator_kernel(
    x1_ref, x2_ref, x3_ref,          # (3, M1), (3, M2), (3, M3)  channel-major pixels
    w1_ref, g1_ref, b1_ref,          # (64, 3),   (64, 1),  (64, 1)
    w2_ref, g2_ref, b2_ref,          # (128, 64), (128, 1), (128, 1)
    w3_ref, g3_ref, b3_ref,          # (1, 128),  (1, 1),   (1, 1)
    o_ref,                           # (1, M3)
    *, eps, negative_slope):
    f32 = jnp.float32

    def stats(y):
        # One-sweep per-channel batch statistics over the pixel (lane) axis.
        m = float(y.shape[1])
        s = jnp.sum(y, axis=1, keepdims=True)
        ss = jnp.sum(y * y, axis=1, keepdims=True)
        mean = s / m
        var = jnp.maximum(ss / m - mean * mean, 0.0)   # biased var (PyTorch training mode)
        return mean, var

    def lrelu(y):
        return jnp.where(y >= 0, y, negative_slope * y)

    # ---- layer 1: Conv2d(3->64, k=1, s=2) as 3 VPU broadcast-MACs (keep K=3 off the MXU) ----
    w1 = w1_ref[...].astype(f32)

    def conv1(x):  # (3, M) -> (64, M)
        return (w1[:, 0:1] * x[0:1, :]
                + w1[:, 1:2] * x[1:2, :]
                + w1[:, 2:3] * x[2:3, :])

    y1_full = conv1(x1_ref[...].astype(f32))                    # (64, M1): stats only
    mean1, var1 = stats(y1_full)
    scale1 = jax.lax.rsqrt(var1 + eps) * g1_ref[...]
    shift1 = b1_ref[...] - mean1 * scale1

    def layer1(x):                                              # BN + LeakyReLU on a pixel subset
        return lrelu(conv1(x) * scale1 + shift1)

    a1_2 = layer1(x2_ref[...].astype(f32))                      # (64, M2): feeds layer 2
    a1_3 = layer1(x3_ref[...].astype(f32))                      # (64, M3): feeds layer 2 -> 3

    # ---- layer 2: Conv2d(64->128, k=1, s=2) on the MXU ----
    w2 = w2_ref[...].astype(f32)
    y2_full = jnp.dot(w2, a1_2, preferred_element_type=f32)     # (128, M2): stats only
    mean2, var2 = stats(y2_full)
    scale2 = jax.lax.rsqrt(var2 + eps) * g2_ref[...]
    shift2 = b2_ref[...] - mean2 * scale2
    a2_3 = lrelu(jnp.dot(w2, a1_3, preferred_element_type=f32) * scale2 + shift2)   # (128, M3)

    # ---- layer 3: Conv2d(128->1, k=1, s=2) + BN + LeakyReLU + Sigmoid ----
    w3 = w3_ref[...].astype(f32)
    y3 = jnp.dot(w3, a2_3, preferred_element_type=f32)          # (1, M3)
    mean3, var3 = stats(y3)
    scale3 = jax.lax.rsqrt(var3 + eps) * g3_ref[...]
    shift3 = b3_ref[...] - mean3 * scale3
    a3 = lrelu(y3 * scale3 + shift3)
    o_ref[...] = jax.nn.sigmoid(a3).astype(o_ref.dtype)


def init_params(key):
    """Deterministic synthetic parameters, channel-major weight layout.

    Conv biases are intentionally omitted: under training-mode BatchNorm a
    per-channel bias is exactly cancelled by the mean subtraction.
    """
    layer_dims = [(3, 64), (64, 128), (128, 1)]
    params = []
    for i, (cin, cout) in enumerate(layer_dims):
        k_w, k_g, k_b = jax.random.split(jax.random.fold_in(key, i), 3)
        # PyTorch Conv2d weight (cout, cin, 1, 1) squeezed -> (cout, cin)
        w = jax.random.normal(k_w, (cout, cin), jnp.float32) * 0.1
        gamma = 1.0 + 0.1 * jax.random.normal(k_g, (cout, 1), jnp.float32)
        beta = 0.1 * jax.random.normal(k_b, (cout, 1), jnp.float32)
        params.append((w, gamma, beta))
    return params


def perceptual_discriminator(x_nchw, params):
    """Forward pass.  x_nchw: (N, 3, H, W) float32 -> (N, 1, H//8-ish, W//8-ish)."""
    n = x_nchw.shape[0]

    def channel_major(xs):
        # (N, C, Hs, Ws) strided slice -> (C, N*Hs*Ws).  Only the small
        # subsampled slice is re-laid-out (C never lands on the lane axis).
        c = xs.shape[1]
        return jnp.transpose(xs, (1, 0, 2, 3)).reshape(c, -1)

    xs1 = x_nchw[:, :, ::2, ::2]      # pixels read by conv 1  (all its output positions)
    xs2 = x_nchw[:, :, ::4, ::4]      # pixels whose conv-1 output feeds conv 2
    xs3 = x_nchw[:, :, ::8, ::8]      # pixels whose conv-2 output feeds conv 3
    h_out, w_out = xs3.shape[2], xs3.shape[3]
    m3 = n * h_out * w_out

    x1, x2, x3 = channel_major(xs1), channel_major(xs2), channel_major(xs3)
    (w1, g1, b1), (w2, g2, b2), (w3, g3, b3) = params

    kernel = functools.partial(
        _fused_discriminator_kernel, eps=1e-5, negative_slope=0.2)

    vmem = pl.BlockSpec(memory_space=pltpu.MemorySpace.VMEM)
    out_flat = pl.pallas_call(
        kernel,
        out_shape=jax.ShapeDtypeStruct((1, m3), jnp.float32),
        in_specs=[vmem] * 12,
        out_specs=vmem,
        compiler_params=pltpu.CompilerParams(
            vmem_limit_bytes=32 * 1024 * 1024),   # explicit cap; actual usage is tiny
    )(x1, x2, x3, w1, g1, b1, w2, g2, b2, w3, g3, b3)

    # (1, N*H3*W3) -> (N, 1, H3, W3): pure reshape, no data movement.
    return out_flat.reshape(n, h_out, w_out)[:, None, :, :]


if __name__ == "__main__":
    key = jax.random.PRNGKey(0)
    k_x, k_p = jax.random.split(key)

    # Small deterministic input: batch=2, channels=3 (RGB), spatial 16x16.
    x = jax.random.normal(k_x, (2, 3, 16, 16), jnp.float32)
    params = init_params(k_p)

    out = jax.block_until_ready(perceptual_discriminator(x, params))

    assert out.shape == (2, 1, 2, 2), out.shape
    assert bool(jnp.all(jnp.isfinite(out)))
    assert bool(jnp.all((out >= 0.0) & (out <= 1.0)))   # sigmoid range
    print("KERNEL_OK")
</pallas_src>

<mosaic_0001>
module attributes {stable_mosaic.version = 11 : i64} {
  func.func @_fused_discriminator_kernel(%arg0: memref<3x128xf32, #tpu.memory_space<vmem>>, %arg1: memref<3x32xf32, #tpu.memory_space<vmem>>, %arg2: memref<3x8xf32, #tpu.memory_space<vmem>>, %arg3: memref<64x3xf32, #tpu.memory_space<vmem>>, %arg4: memref<64x1xf32, #tpu.memory_space<vmem>>, %arg5: memref<64x1xf32, #tpu.memory_space<vmem>>, %arg6: memref<128x64xf32, #tpu.memory_space<vmem>>, %arg7: memref<128x1xf32, #tpu.memory_space<vmem>>, %arg8: memref<128x1xf32, #tpu.memory_space<vmem>>, %arg9: memref<1x128xf32, #tpu.memory_space<vmem>>, %arg10: memref<1x1xf32, #tpu.memory_space<vmem>>, %arg11: memref<1x1xf32, #tpu.memory_space<vmem>>, %arg12: memref<1x8xf32, #tpu.memory_space<vmem>>) attributes {dimension_semantics = [], scalar_prefetch = 0 : i64, scratch_operands = 0 : i64, tpu.core_type = #tpu.core_type<tc>} {
    %c0 = arith.constant 0 : index
    %c0_0 = arith.constant 0 : index
    %0 = vector.load %arg3[%c0, %c0_0] : memref<64x3xf32, #tpu.memory_space<vmem>>, vector<64x3xf32>
    %c0_1 = arith.constant 0 : index
    %c0_2 = arith.constant 0 : index
    %1 = vector.load %arg0[%c0_1, %c0_2] : memref<3x128xf32, #tpu.memory_space<vmem>>, vector<3x128xf32>
    %2 = vector.extract_strided_slice %0 {offsets = [0, 0], sizes = [64, 1], strides = [1, 1]} : vector<64x3xf32> to vector<64x1xf32>
    %3 = vector.extract_strided_slice %1 {offsets = [0, 0], sizes = [1, 128], strides = [1, 1]} : vector<3x128xf32> to vector<1x128xf32>
    %4 = vector.broadcast %2 : vector<64x1xf32> to vector<64x128xf32>
    %5 = vector.broadcast %3 : vector<1x128xf32> to vector<64x128xf32>
    %6 = arith.mulf %4, %5 : vector<64x128xf32>
    %7 = vector.extract_strided_slice %0 {offsets = [0, 1], sizes = [64, 1], strides = [1, 1]} : vector<64x3xf32> to vector<64x1xf32>
    %8 = vector.extract_strided_slice %1 {offsets = [1, 0], sizes = [1, 128], strides = [1, 1]} : vector<3x128xf32> to vector<1x128xf32>
    %9 = vector.broadcast %7 : vector<64x1xf32> to vector<64x128xf32>
    %10 = vector.broadcast %8 : vector<1x128xf32> to vector<64x128xf32>
    %11 = arith.mulf %9, %10 : vector<64x128xf32>
    %12 = arith.addf %6, %11 : vector<64x128xf32>
    %13 = vector.extract_strided_slice %0 {offsets = [0, 2], sizes = [64, 1], strides = [1, 1]} : vector<64x3xf32> to vector<64x1xf32>
    %14 = vector.extract_strided_slice %1 {offsets = [2, 0], sizes = [1, 128], strides = [1, 1]} : vector<3x128xf32> to vector<1x128xf32>
    %15 = vector.broadcast %13 : vector<64x1xf32> to vector<64x128xf32>
    %16 = vector.broadcast %14 : vector<1x128xf32> to vector<64x128xf32>
    %17 = arith.mulf %15, %16 : vector<64x128xf32>
    %18 = arith.addf %12, %17 : vector<64x128xf32>
    %cst = arith.constant dense<0.000000e+00> : vector<64xf32>
    %19 = vector.multi_reduction <add>, %18, %cst [1] : vector<64x128xf32> to vector<64xf32>
    %20 = vector.shape_cast %19 : vector<64xf32> to vector<64x1xf32>
    %21 = arith.mulf %18, %18 : vector<64x128xf32>
    %cst_3 = arith.constant dense<0.000000e+00> : vector<64xf32>
    %22 = vector.multi_reduction <add>, %21, %cst_3 [1] : vector<64x128xf32> to vector<64xf32>
    %23 = vector.shape_cast %22 : vector<64xf32> to vector<64x1xf32>
    %cst_4 = arith.constant 1.280000e+02 : f32
    %24 = vector.broadcast %cst_4 : f32 to vector<64x1xf32>
    %25 = arith.divf %20, %24 : vector<64x1xf32>
    %cst_5 = arith.constant 1.280000e+02 : f32
    %26 = vector.broadcast %cst_5 : f32 to vector<64x1xf32>
    %27 = arith.divf %23, %26 : vector<64x1xf32>
    %28 = arith.mulf %25, %25 : vector<64x1xf32>
    %29 = arith.subf %27, %28 : vector<64x1xf32>
    %cst_6 = arith.constant 0.000000e+00 : f32
    %30 = vector.broadcast %cst_6 : f32 to vector<64x1xf32>
    %31 = arith.maximumf %29, %30 : vector<64x1xf32>
    %cst_7 = arith.constant 9.99999974E-6 : f32
    %32 = vector.broadcast %cst_7 : f32 to vector<64x1xf32>
    %33 = arith.addf %31, %32 : vector<64x1xf32>
    %34 = math.rsqrt %33 : vector<64x1xf32>
    %c0_8 = arith.constant 0 : index
    %c0_9 = arith.constant 0 : index
    %35 = vector.load %arg4[%c0_8, %c0_9] : memref<64x1xf32, #tpu.memory_space<vmem>>, vector<64x1xf32>
    %36 = arith.mulf %34, %35 : vector<64x1xf32>
    %c0_10 = arith.constant 0 : index
    %c0_11 = arith.constant 0 : index
    %37 = vector.load %arg5[%c0_10, %c0_11] : memref<64x1xf32, #tpu.memory_space<vmem>>, vector<64x1xf32>
    %38 = arith.mulf %25, %36 : vector<64x1xf32>
    %39 = arith.subf %37, %38 : vector<64x1xf32>
    %c0_12 = arith.constant 0 : index
    %c0_13 = arith.constant 0 : index
    %40 = vector.load %arg1[%c0_12, %c0_13] : memref<3x32xf32, #tpu.memory_space<vmem>>, vector<3x32xf32>
    %41 = vector.extract_strided_slice %0 {offsets = [0, 0], sizes = [64, 1], strides = [1, 1]} : vector<64x3xf32> to vector<64x1xf32>
    %42 = vector.extract_strided_slice %40 {offsets = [0, 0], sizes = [1, 32], strides = [1, 1]} : vector<3x32xf32> to vector<1x32xf32>
    %43 = vector.broadcast %41 : vector<64x1xf32> to vector<64x32xf32>
    %44 = vector.broadcast %42 : vector<1x32xf32> to vector<64x32xf32>
    %45 = arith.mulf %43, %44 : vector<64x32xf32>
    %46 = vector.extract_strided_slice %0 {offsets = [0, 1], sizes = [64, 1], strides = [1, 1]} : vector<64x3xf32> to vector<64x1xf32>
    %47 = vector.extract_strided_slice %40 {offsets = [1, 0], sizes = [1, 32], strides = [1, 1]} : vector<3x32xf32> to vector<1x32xf32>
    %48 = vector.broadcast %46 : vector<64x1xf32> to vector<64x32xf32>
    %49 = vector.broadcast %47 : vector<1x32xf32> to vector<64x32xf32>
    %50 = arith.mulf %48, %49 : vector<64x32xf32>
    %51 = arith.addf %45, %50 : vector<64x32xf32>
    %52 = vector.extract_strided_slice %0 {offsets = [0, 2], sizes = [64, 1], strides = [1, 1]} : vector<64x3xf32> to vector<64x1xf32>
    %53 = vector.extract_strided_slice %40 {offsets = [2, 0], sizes = [1, 32], strides = [1, 1]} : vector<3x32xf32> to vector<1x32xf32>
    %54 = vector.broadcast %52 : vector<64x1xf32> to vector<64x32xf32>
    %55 = vector.broadcast %53 : vector<1x32xf32> to vector<64x32xf32>
    %56 = arith.mulf %54, %55 : vector<64x32xf32>
    %57 = arith.addf %51, %56 : vector<64x32xf32>
    %58 = vector.broadcast %36 : vector<64x1xf32> to vector<64x32xf32>
    %59 = arith.mulf %57, %58 : vector<64x32xf32>
    %60 = vector.broadcast %39 : vector<64x1xf32> to vector<64x32xf32>
    %61 = arith.addf %59, %60 : vector<64x32xf32>
    %cst_14 = arith.constant 0.000000e+00 : f32
    %62 = vector.broadcast %cst_14 : f32 to vector<64x32xf32>
    %63 = arith.cmpf oge, %61, %62 : vector<64x32xf32>
    %cst_15 = arith.constant 2.000000e-01 : f32
    %64 = vector.broadcast %cst_15 : f32 to vector<64x32xf32>
    %65 = arith.mulf %64, %61 : vector<64x32xf32>
    %66 = arith.select %63, %61, %65 : vector<64x32xi1>, vector<64x32xf32>
    %c0_16 = arith.constant 0 : index
    %c0_17 = arith.constant 0 : index
    %67 = vector.load %arg2[%c0_16, %c0_17] : memref<3x8xf32, #tpu.memory_space<vmem>>, vector<3x8xf32>
    %68 = vector.extract_strided_slice %0 {offsets = [0, 0], sizes = [64, 1], strides = [1, 1]} : vector<64x3xf32> to vector<64x1xf32>
    %69 = vector.extract_strided_slice %67 {offsets = [0, 0], sizes = [1, 8], strides = [1, 1]} : vector<3x8xf32> to vector<1x8xf32>
    %70 = vector.broadcast %68 : vector<64x1xf32> to vector<64x8xf32>
    %71 = vector.broadcast %69 : vector<1x8xf32> to vector<64x8xf32>
    %72 = arith.mulf %70, %71 : vector<64x8xf32>
    %73 = vector.extract_strided_slice %0 {offsets = [0, 1], sizes = [64, 1], strides = [1, 1]} : vector<64x3xf32> to vector<64x1xf32>
    %74 = vector.extract_strided_slice %67 {offsets = [1, 0], sizes = [1, 8], strides = [1, 1]} : vector<3x8xf32> to vector<1x8xf32>
    %75 = vector.broadcast %73 : vector<64x1xf32> to vector<64x8xf32>
    %76 = vector.broadcast %74 : vector<1x8xf32> to vector<64x8xf32>
    %77 = arith.mulf %75, %76 : vector<64x8xf32>
    %78 = arith.addf %72, %77 : vector<64x8xf32>
    %79 = vector.extract_strided_slice %0 {offsets = [0, 2], sizes = [64, 1], strides = [1, 1]} : vector<64x3xf32> to vector<64x1xf32>
    %80 = vector.extract_strided_slice %67 {offsets = [2, 0], sizes = [1, 8], strides = [1, 1]} : vector<3x8xf32> to vector<1x8xf32>
    %81 = vector.broadcast %79 : vector<64x1xf32> to vector<64x8xf32>
    %82 = vector.broadcast %80 : vector<1x8xf32> to vector<64x8xf32>
    %83 = arith.mulf %81, %82 : vector<64x8xf32>
    %84 = arith.addf %78, %83 : vector<64x8xf32>
    %85 = vector.broadcast %36 : vector<64x1xf32> to vector<64x8xf32>
    %86 = arith.mulf %84, %85 : vector<64x8xf32>
    %87 = vector.broadcast %39 : vector<64x1xf32> to vector<64x8xf32>
    %88 = arith.addf %86, %87 : vector<64x8xf32>
    %cst_18 = arith.constant 0.000000e+00 : f32
    %89 = vector.broadcast %cst_18 : f32 to vector<64x8xf32>
    %90 = arith.cmpf oge, %88, %89 : vector<64x8xf32>
    %cst_19 = arith.constant 2.000000e-01 : f32
    %91 = vector.broadcast %cst_19 : f32 to vector<64x8xf32>
    %92 = arith.mulf %91, %88 : vector<64x8xf32>
    %93 = arith.select %90, %88, %92 : vector<64x8xi1>, vector<64x8xf32>
    %c0_20 = arith.constant 0 : index
    %c0_21 = arith.constant 0 : index
    %94 = vector.load %arg6[%c0_20, %c0_21] : memref<128x64xf32, #tpu.memory_space<vmem>>, vector<128x64xf32>
    %cst_22 = arith.constant dense<0.000000e+00> : vector<128x32xf32>
    %95 = tpu.matmul %94, %66, %cst_22 {dimension_numbers = #tpu.dot_dimension_numbers<[1], [0], [0], [1], [0, 0, 1, 1], [], []>} : vector<128x64xf32>, vector<64x32xf32>, vector<128x32xf32> -> vector<128x32xf32>
    %cst_23 = arith.constant dense<0.000000e+00> : vector<128xf32>
    %96 = vector.multi_reduction <add>, %95, %cst_23 [1] : vector<128x32xf32> to vector<128xf32>
    %97 = vector.shape_cast %96 : vector<128xf32> to vector<128x1xf32>
    %98 = arith.mulf %95, %95 : vector<128x32xf32>
    %cst_24 = arith.constant dense<0.000000e+00> : vector<128xf32>
    %99 = vector.multi_reduction <add>, %98, %cst_24 [1] : vector<128x32xf32> to vector<128xf32>
    %100 = vector.shape_cast %99 : vector<128xf32> to vector<128x1xf32>
    %cst_25 = arith.constant 3.200000e+01 : f32
    %101 = vector.broadcast %cst_25 : f32 to vector<128x1xf32>
    %102 = arith.divf %97, %101 : vector<128x1xf32>
    %cst_26 = arith.constant 3.200000e+01 : f32
    %103 = vector.broadcast %cst_26 : f32 to vector<128x1xf32>
    %104 = arith.divf %100, %103 : vector<128x1xf32>
    %105 = arith.mulf %102, %102 : vector<128x1xf32>
    %106 = arith.subf %104, %105 : vector<128x1xf32>
    %cst_27 = arith.constant 0.000000e+00 : f32
    %107 = vector.broadcast %cst_27 : f32 to vector<128x1xf32>
    %108 = arith.maximumf %106, %107 : vector<128x1xf32>
    %cst_28 = arith.constant 9.99999974E-6 : f32
    %109 = vector.broadcast %cst_28 : f32 to vector<128x1xf32>
    %110 = arith.addf %108, %109 : vector<128x1xf32>
    %111 = math.rsqrt %110 : vector<128x1xf32>
    %c0_29 = arith.constant 0 : index
    %c0_30 = arith.constant 0 : index
    %112 = vector.load %arg7[%c0_29, %c0_30] : memref<128x1xf32, #tpu.memory_space<vmem>>, vector<128x1xf32>
    %113 = arith.mulf %111, %112 : vector<128x1xf32>
    %c0_31 = arith.constant 0 : index
    %c0_32 = arith.constant 0 : index
    %114 = vector.load %arg8[%c0_31, %c0_32] : memref<128x1xf32, #tpu.memory_space<vmem>>, vector<128x1xf32>
    %115 = arith.mulf %102, %113 : vector<128x1xf32>
    %116 = arith.subf %114, %115 : vector<128x1xf32>
    %cst_33 = arith.constant dense<0.000000e+00> : vector<128x8xf32>
    %117 = tpu.matmul %94, %93, %cst_33 {dimension_numbers = #tpu.dot_dimension_numbers<[1], [0], [0], [1], [0, 0, 1, 1], [], []>} : vector<128x64xf32>, vector<64x8xf32>, vector<128x8xf32> -> vector<128x8xf32>
    %118 = vector.broadcast %113 : vector<128x1xf32> to vector<128x8xf32>
    %119 = arith.mulf %117, %118 : vector<128x8xf32>
    %120 = vector.broadcast %116 : vector<128x1xf32> to vector<128x8xf32>
    %121 = arith.addf %119, %120 : vector<128x8xf32>
    %cst_34 = arith.constant 0.000000e+00 : f32
    %122 = vector.broadcast %cst_34 : f32 to vector<128x8xf32>
    %123 = arith.cmpf oge, %121, %122 : vector<128x8xf32>
    %cst_35 = arith.constant 2.000000e-01 : f32
    %124 = vector.broadcast %cst_35 : f32 to vector<128x8xf32>
    %125 = arith.mulf %124, %121 : vector<128x8xf32>
    %126 = arith.select %123, %121, %125 : vector<128x8xi1>, vector<128x8xf32>
    %c0_36 = arith.constant 0 : index
    %c0_37 = arith.constant 0 : index
    %127 = vector.load %arg9[%c0_36, %c0_37] : memref<1x128xf32, #tpu.memory_space<vmem>>, vector<1x128xf32>
    %cst_38 = arith.constant dense<0.000000e+00> : vector<1x8xf32>
    %128 = tpu.matmul %127, %126, %cst_38 {dimension_numbers = #tpu.dot_dimension_numbers<[1], [0], [0], [1], [0, 0, 1, 1], [], []>} : vector<1x128xf32>, vector<128x8xf32>, vector<1x8xf32> -> vector<1x8xf32>
    %cst_39 = arith.constant dense<0.000000e+00> : vector<1xf32>
    %129 = vector.multi_reduction <add>, %128, %cst_39 [1] : vector<1x8xf32> to vector<1xf32>
    %130 = vector.shape_cast %129 : vector<1xf32> to vector<1x1xf32>
    %131 = arith.mulf %128, %128 : vector<1x8xf32>
    %cst_40 = arith.constant dense<0.000000e+00> : vector<1xf32>
    %132 = vector.multi_reduction <add>, %131, %cst_40 [1] : vector<1x8xf32> to vector<1xf32>
    %133 = vector.shape_cast %132 : vector<1xf32> to vector<1x1xf32>
    %cst_41 = arith.constant 8.000000e+00 : f32
    %134 = vector.broadcast %cst_41 : f32 to vector<1x1xf32>
    %135 = arith.divf %130, %134 : vector<1x1xf32>
    %cst_42 = arith.constant 8.000000e+00 : f32
    %136 = vector.broadcast %cst_42 : f32 to vector<1x1xf32>
    %137 = arith.divf %133, %136 : vector<1x1xf32>
    %138 = arith.mulf %135, %135 : vector<1x1xf32>
    %139 = arith.subf %137, %138 : vector<1x1xf32>
    %cst_43 = arith.constant 0.000000e+00 : f32
    %140 = vector.broadcast %cst_43 : f32 to vector<1x1xf32>
    %141 = arith.maximumf %139, %140 : vector<1x1xf32>
    %cst_44 = arith.constant 9.99999974E-6 : f32
    %142 = vector.broadcast %cst_44 : f32 to vector<1x1xf32>
    %143 = arith.addf %141, %142 : vector<1x1xf32>
    %144 = math.rsqrt %143 : vector<1x1xf32>
    %c0_45 = arith.constant 0 : index
    %c0_46 = arith.constant 0 : index
    %145 = vector.load %arg10[%c0_45, %c0_46] : memref<1x1xf32, #tpu.memory_space<vmem>>, vector<1x1xf32>
    %146 = arith.mulf %144, %145 : vector<1x1xf32>
    %c0_47 = arith.constant 0 : index
    %c0_48 = arith.constant 0 : index
    %147 = vector.load %arg11[%c0_47, %c0_48] : memref<1x1xf32, #tpu.memory_space<vmem>>, vector<1x1xf32>
    %148 = arith.mulf %135, %146 : vector<1x1xf32>
    %149 = arith.subf %147, %148 : vector<1x1xf32>
    %150 = vector.broadcast %146 : vector<1x1xf32> to vector<1x8xf32>
    %151 = arith.mulf %128, %150 : vector<1x8xf32>
    %152 = vector.broadcast %149 : vector<1x1xf32> to vector<1x8xf32>
    %153 = arith.addf %151, %152 : vector<1x8xf32>
    %cst_49 = arith.constant 0.000000e+00 : f32
    %154 = vector.broadcast %cst_49 : f32 to vector<1x8xf32>
    %155 = arith.cmpf oge, %153, %154 : vector<1x8xf32>
    %cst_50 = arith.constant 2.000000e-01 : f32
    %156 = vector.broadcast %cst_50 : f32 to vector<1x8xf32>
    %157 = arith.mulf %156, %153 : vector<1x8xf32>
    %158 = arith.select %155, %153, %157 : vector<1x8xi1>, vector<1x8xf32>
    %159 = arith.negf %158 : vector<1x8xf32>
    %160 = math.exp %159 : vector<1x8xf32>
    %cst_51 = arith.constant 1.000000e+00 : f32
    %161 = vector.broadcast %cst_51 : f32 to vector<1x8xf32>
    %162 = arith.addf %161, %160 : vector<1x8xf32>
    %163 = arith.divf %161, %162 : vector<1x8xf32>
    %c0_52 = arith.constant 0 : index
    %c0_53 = arith.constant 0 : index
    %164 = vector.load %arg12[%c0_52, %c0_53] : memref<1x8xf32, #tpu.memory_space<vmem>>, vector<1x8xf32>
    tpu.vector_store %arg12[%c0_52, %c0_53], %163 {strides = array<i32>} : memref<1x8xf32, #tpu.memory_space<vmem>>, vector<1x8xf32>,
    return
  }
}

</mosaic_0001>

<bundles_post_ra>
// kernel: tpu_custom_call.1
= control target key start
LH: loop header
LB: loop body
LE: loop exit
PB: predicated region body
PF: predicated region fallthrough
CT: control target
= control target key end

     0   :  { %s2712_s0 = inlined_call_operand.vmem [shape: f32[3,128], index: 0, kind: input, shape index: {}]   ;;  %s2713_s1 = inlined_call_operand.vmem [shape: f32[3,32], index: 1, kind: input, shape index: {}]   ;;  %s2714_s2 = inlined_call_operand.vmem [shape: f32[3,8], index: 2, kind: input, shape index: {}]   ;;  %s2715_s3 = inlined_call_operand.vmem [shape: f32[64,3], index: 3, kind: input, shape index: {}]   ;;  %s2716_s4 = inlined_call_operand.vmem [shape: f32[64,1], index: 4, kind: input, shape index: {}]   ;;  %s2717_s5 = inlined_call_operand.vmem [shape: f32[64,1], index: 5, kind: input, shape index: {}]   ;;  %s2718_s6 = inlined_call_operand.vmem [shape: f32[128,64], index: 6, kind: input, shape index: {}]   ;;  %s2719_s7 = inlined_call_operand.vmem [shape: f32[128,1], index: 7, kind: input, shape index: {}]   ;;  %s2720_s8 = inlined_call_operand.vmem [shape: f32[128,1], index: 8, kind: input, shape index: {}]   ;;  %s2721_s9 = inlined_call_operand.vmem [shape: f32[1,128], index: 9, kind: input, shape index: {}]   ;;  %s2722_s10 = inlined_call_operand.<no memory space> [shape: f32[1,1], index: 10, kind: input, shape index: {}]   ;;  %s2723_s12 = inlined_call_operand.hbm [shape: f32[1,8], index: 12, kind: output, shape index: {}]   ;;  %s2724_s11 = inlined_call_operand.<no memory space> [shape: f32[1,1], index: 11, kind: input, shape index: {}]  }
   0x1   :  { %v17_v0 = vstv %s2722_s10  ;;  %v19_v1 = vstv %s2724_s11 }
   0x2   :  { %18 = vst [vmem:[#allocation2] sm:$0x1] %v17_v0  ;;  %20 = vst [vmem:[#allocation3] sm:$0x1] %v19_v1 }
   0x3   :  { %v52_v2 = vld [vmem:[%s2715_s3 + $0x30] sm:$0xff]  ;;  %v51_v3 = vld [vmem:[%s2715_s3 + $0x28] sm:$0xff]  ;;  %v1962_v4 = vmov 2   ;;  %v1963_v5 = vmov 0   ;;  %v50_v6 = vld [vmem:[%s2715_s3 + $0x20] sm:$0xff] }
   0x4   :  { %1872 = vset.pattern.permute.xlu0 %v1962_v4  ;;  %1866 = vset.pattern.permute.xlu1 %v1963_v5 }
   0x5   :  { %87 = vperm.xlu1 %1866, %v52_v2   ;;  %180 = vperm.xlu0 %1872, %v51_v3  }
   0x6   :  { %21 = vsyncpa [#allocation5], 0  ;;  %v1964_v7 = vmov 1   ;;  %v53_v8 = vld [vmem:[%s2715_s3 + $0x38] sm:$0xff]  ;;  %v48_v9 = vld [vmem:[%s2715_s3 + $0x10] sm:$0xff]  ;;  %v95_v15 = vlaneseq  ;;  %vm630_vm0 = vcmask 523264  }
   0x7   :  { %v47_v10 = vld [vmem:[%s2715_s3 + $0x8] sm:$0xff]  ;;  %v49_v11 = vld [vmem:[%s2715_s3 + $0x18] sm:$0xff]  ;;  %v46_v12 = vld [vmem:[%s2715_s3] sm:$0xff] }
   0x8   :  { %v96_v18 = vshrl.u32 %v95_v15, 7  ;;  %v54_v23 = vld [vmem:[%s2712_s0] sm:$0x7] }
   0x9   :  { %1867 = vset.pattern.permute.xlu1 %v1964_v7  ;;  %176 = vperm.xlu0 %1872, %v50_v6   ;;  %v348_v24 = vld [vmem:[%s2713_s1] sm:$0x7] }
   0xa   :  { %132 = vperm.xlu1 %1867, %v52_v2   ;;  %v141_v19 = vsub.s32 1, %v96_v18  ;;  %v2067_v21 = vsub.s32 0, %v96_v18  ;;  %v521_v26 = vld [vmem:[%s2714_s2] sm:$0x7]  ;;  %v193_v33 = vsub.s32 2, %v96_v18 }
   0xc   :  { %v2075_v25 = vrot.slane %v54_v23, %v141_v19  ;;  %v2082_v28 = vrot.slane %v348_v24, %v141_v19  ;;  %v2084_v29 = vrot.slane %v521_v26, %v141_v19  ;;  %v2087_v30 = vrot.slane %v54_v23, %v2067_v21 }
   0xd   :  { %1875 = vset.pattern.permute.xlu0 %v1964_v7  ;;  %v2090_v31 = vrot.slane %v348_v24, %v2067_v21  ;;  %v2093_v34 = vrot.slane %v521_v26, %v2067_v21  ;;  %v2102_v41 = vrot.slane %v54_v23, %v193_v33  ;;  %v2104_v42 = vrot.slane %v348_v24, %v193_v33 }
   0xe   :  { %1868 = vset.pattern.permute.xlu1 %v1962_v4  ;;  %136 = vperm.xlu0 %1875, %v53_v8   ;;  %v2106_v43 = vrot.slane %v521_v26, %v193_v33 }
   0xf   :  { %188 = vperm.xlu1 %1868, %v53_v8  }
  0x12   :  { %116 = vperm.xlu0 %1875, %v48_v9  }
  0x13   :  { %1869 = vset.pattern.permute.xlu1 %v1964_v7 }
  0x14   :  { %128 = vperm.xlu1 %1869, %v51_v3  }
  0x16   :  { %112 = vperm.xlu0 %1875, %v47_v10  }
  0x18   :  { %1870 = vset.pattern.permute.xlu1 %v1962_v4 }
  0x19   :  { %184 = vperm.xlu1 %1870, %v52_v2  }
  0x1a   :  { %1879 = vset.pattern.permute.xlu0 %v1963_v5 }
  0x1b   :  { %92 = vperm.xlu0 %1879, %v53_v8  }
  0x1d   :  { %1871 = vset.pattern.permute.xlu1 %v1964_v7 }
  0x1e   :  { %124 = vperm.xlu1 %1871, %v50_v6  }
  0x1f   :  { %82 = vperm.xlu0 %1879, %v51_v3  }
  0x22   :  { %1873 = vset.pattern.permute.xlu1 %v1963_v5 }
  0x23   :  { %72 = vperm.xlu1 %1873, %v49_v11   ;;  %77 = vperm.xlu0 %1879, %v50_v6  }
  0x27   :  { %1874 = vset.pattern.permute.xlu1 %v1964_v7  ;;  %57 = vperm.xlu0 %1879, %v46_v12  }
  0x28   :  { %120 = vperm.xlu1 %1874, %v49_v11  }
  0x2b   :  { %1883 = vset.pattern.permute.xlu0 %v1962_v4 }
  0x2c   :  { %1876 = vset.pattern.permute.xlu1 %v1963_v5  ;;  %160 = vperm.xlu0 %1883, %v46_v12  }
  0x2d   :  { %67 = vperm.xlu1 %1876, %v48_v9  }
  0x30   :  { %1885 = vset.pattern.permute.xlu0 %v1963_v5 }
  0x31   :  { %1877 = vset.pattern.permute.xlu1 %v1962_v4 }
  0x32   :  { %172 = vperm.xlu1 %1877, %v49_v11  }
  0x36   :  { %1878 = vset.pattern.permute.xlu1 %v1963_v5 }
  0x37   :  { %62 = vperm.xlu1 %1878, %v47_v10  }
  0x3b   :  { %1880 = vset.pattern.permute.xlu1 %v1962_v4 }
  0x3c   :  { %168 = vperm.xlu1 %1880, %v48_v9  }
  0x40   :  { %1881 = vset.pattern.permute.xlu1 %v1964_v7 }
  0x41   :  { %108 = vperm.xlu1 %1881, %v46_v12  }
  0x45   :  { %1882 = vset.pattern.permute.xlu1 %v1962_v4 }
  0x46   :  { %164 = vperm.xlu1 %1882, %v47_v10  }
  0x4a   :  { %1884 = vset.pattern.permute.xlu1 %v1963_v5 }
  0x80   :  { %v88_v13 = vpop.permute.xlu1 %87  ;;  %v2063_v14 = vpop.permute.xlu0 %180 }
  0x81   :  { %v105_v39 = vmul.f32 %v2087_v30, %v88_v13  ;;  %v359_v40 = vmul.f32 %v2090_v31, %v88_v13  ;;  %v532_v44 = vmul.f32 %v2093_v34, %v88_v13  ;;  %v390_v26 = vmul.f32 %v2104_v42, %v2063_v14 }
  0x84   :  { %v2065_v16 = vpop.permute.xlu0 %176 }
  0x85   :  { %v133_v17 = vpop.permute.xlu1 %132 }
  0x86   :  { %v149_v35 = vmul.f32 %v2075_v25, %v133_v17  ;;  %v371_v37 = vmul.f32 %v2082_v28, %v133_v17  ;;  %v544_v38 = vmul.f32 %v2084_v29, %v133_v17 }
  0x88   :  { %v157_v48 = vadd.f32 %v149_v35, %v105_v39  ;;  %v379_v54 = vadd.f32 %v371_v37, %v359_v40  ;;  %v552_v55 = vadd.f32 %v544_v38, %v532_v44 }
  0x89   :  { %v137_v20 = vpop.permute.xlu0 %136 }
  0x8a   :  { %v189_v22 = vpop.permute.xlu1 %188  ;;  %v372_v45 = vmul.f32 %v2082_v28, %v137_v20  ;;  %v545_v46 = vmul.f32 %v2084_v29, %v137_v20  ;;  %v150_v50 = vmul.f32 %v2075_v25, %v137_v20 }
  0x8b   :  { %v202_v60 = vmul.f32 %v2102_v41, %v189_v22  ;;  %v392_v2 = vmul.f32 %v2104_v42, %v189_v22  ;;  %v565_v8 = vmul.f32 %v2106_v43, %v189_v22  ;;  %v200_v22 = vmul.f32 %v2102_v41, %v2063_v14 }
  0x8d   :  { %v2080_v27 = vpop.permute.xlu0 %116 }
  0x8f   :  { %v129_v32 = vpop.permute.xlu1 %128 }
  0x90   :  { %v370_v4 = vmul.f32 %v2082_v28, %v129_v32  ;;  %v543_v5 = vmul.f32 %v2084_v29, %v129_v32  ;;  %v148_v7 = vmul.f32 %v2075_v25, %v129_v32  ;;  %v563_v32 = vmul.f32 %v2106_v43, %v2063_v14 }
  0x91   :  { %v2096_v36 = vpop.permute.xlu0 %112  ;;  %v199_v14 = vmul.f32 %v2102_v41, %v2065_v16 }
  0x94   :  { %v185_v47 = vpop.permute.xlu1 %184 }
  0x95   :  { %v201_v49 = vmul.f32 %v2102_v41, %v185_v47  ;;  %v391_v51 = vmul.f32 %v2104_v42, %v185_v47  ;;  %v564_v52 = vmul.f32 %v2106_v43, %v185_v47 }
  0x96   :  { %v93_v53 = vpop.permute.xlu0 %92 }
  0x97   :  { %v360_v56 = vmul.f32 %v2090_v31, %v93_v53  ;;  %v533_v57 = vmul.f32 %v2093_v34, %v93_v53  ;;  %v209_v58 = vadd.f32 %v201_v49, %v157_v48  ;;  %v106_v59 = vmul.f32 %v2087_v30, %v93_v53 }
  0x98   :  { %v2119_v61 = vadd.f32 %v391_v51, %v379_v54  ;;  %v2121_v62 = vadd.f32 %v564_v52, %v552_v55  ;;  %v562_v54 = vmul.f32 %v2106_v43, %v2065_v16 }
  0x99   :  { %v125_v63 = vpop.permute.xlu1 %124  ;;  %223 = vadd.xlane.f32.xlu0 %v209_v58  ;;  %v158_v0 = vadd.f32 %v150_v50, %v106_v59  ;;  %v380_v1 = vadd.f32 %v372_v45, %v360_v56  ;;  %v553_v3 = vadd.f32 %v545_v46, %v533_v57  ;;  %v389_v50 = vmul.f32 %v2104_v42, %v2065_v16 }
  0x9a   :  { %v83_v6 = vpop.permute.xlu0 %82  ;;  %v369_v20 = vmul.f32 %v2082_v28, %v125_v63  ;;  %v147_v38 = vmul.f32 %v2075_v25, %v125_v63  ;;  %v542_v39 = vmul.f32 %v2084_v29, %v125_v63  ;;  %v233_v52 = vmul.f32 %v209_v58, %v209_v58 }
  0x9b   :  { %v358_v9 = vmul.f32 %v2090_v31, %v83_v6  ;;  %v531_v10 = vmul.f32 %v2093_v34, %v83_v6  ;;  %v210_v11 = vadd.f32 %v202_v60, %v158_v0  ;;  %v104_v12 = vmul.f32 %v2087_v30, %v83_v6 }
  0x9c   :  { %v2131_v13 = vadd.f32 %v392_v2, %v380_v1  ;;  %v2133_v15 = vadd.f32 %v565_v8, %v553_v3 }
  0x9d   :  { %225 = vadd.xlane.f32.xlu1 %v210_v11  ;;  %v156_v17 = vadd.f32 %v148_v7, %v104_v12  ;;  %v378_v18 = vadd.f32 %v370_v4, %v358_v9  ;;  %v551_v19 = vadd.f32 %v543_v5, %v531_v10  ;;  %v234_v37 = vmul.f32 %v210_v11, %v210_v11 }
  0x9e   :  { %v73_v23 = vpop.permute.xlu1 %72  ;;  %v78_v24 = vpop.permute.xlu0 %77 }
  0x9f   :  { %v103_v33 = vmul.f32 %v2087_v30, %v78_v24  ;;  %v357_v35 = vmul.f32 %v2090_v31, %v78_v24  ;;  %v530_v40 = vmul.f32 %v2093_v34, %v78_v24  ;;  %v208_v44 = vadd.f32 %v200_v22, %v156_v17 }
  0xa0   :  { %v2147_v45 = vadd.f32 %v390_v26, %v378_v18  ;;  %v2151_v48 = vadd.f32 %v563_v32, %v551_v19  ;;  %v356_v58 = vmul.f32 %v2090_v31, %v73_v23  ;;  %v102_v16 = vmul.f32 %v2087_v30, %v73_v23 }
  0xa1   :  { %v377_v46 = vadd.f32 %v369_v20, %v357_v35  ;;  %249 = vadd.xlane.f32.xlu1 %v234_v37  ;;  %v155_v47 = vadd.f32 %v147_v38, %v103_v33  ;;  %v550_v49 = vadd.f32 %v542_v39, %v530_v40  ;;  %221 = vadd.xlane.f32.xlu0 %v208_v44 }
  0xa2   :  { %v232_v57 = vmul.f32 %v208_v44, %v208_v44  ;;  %v529_v2 = vmul.f32 %v2093_v34, %v73_v23  ;;  %v367_v24 = vmul.f32 %v2082_v28, %v2080_v27  ;;  %v58_v22 = vpop.permute.xlu0 %57  ;;  %v145_v26 = vmul.f32 %v2075_v25, %v2080_v27 }
  0xa3   :  { %v121_v51 = vpop.permute.xlu1 %120  ;;  %v207_v53 = vadd.f32 %v199_v14, %v155_v47  ;;  %v2157_v55 = vadd.f32 %v389_v50, %v377_v46  ;;  %v2159_v56 = vadd.f32 %v562_v54, %v550_v49  ;;  %v540_v32 = vmul.f32 %v2084_v29, %v2080_v27 }
  0xa4   :  { %v368_v60 = vmul.f32 %v2082_v28, %v121_v51  ;;  %v146_v63 = vmul.f32 %v2075_v25, %v121_v51  ;;  %v541_v0 = vmul.f32 %v2084_v29, %v121_v51  ;;  %v353_v50 = vmul.f32 %v2090_v31, %v58_v22 }
  0xa5   :  { %247 = vadd.xlane.f32.xlu1 %v233_v52  ;;  %219 = vadd.xlane.f32.xlu0 %v207_v53  ;;  %v231_v1 = vmul.f32 %v207_v53, %v207_v53  ;;  %v526_v27 = vmul.f32 %v2093_v34, %v58_v22 }
  0xa6   :  { %v154_v4 = vadd.f32 %v146_v63, %v102_v16  ;;  %v376_v5 = vadd.f32 %v368_v60, %v356_v58  ;;  %v549_v8 = vadd.f32 %v541_v0, %v529_v2  ;;  %v366_v58 = vmul.f32 %v2082_v28, %v2096_v36 }
  0xa7   :  { %v161_v46 = vpop.permute.xlu0 %160 }
  0xa8   :  { %v68_v59 = vpop.permute.xlu1 %67  ;;  %v385_v53 = vmul.f32 %v2104_v42, %v161_v46  ;;  %v558_v54 = vmul.f32 %v2106_v43, %v161_v46 }
  0xa9   :  { %245 = vadd.xlane.f32.xlu1 %v232_v57  ;;  %v355_v19 = vmul.f32 %v2090_v31, %v68_v59  ;;  %v101_v20 = vmul.f32 %v2087_v30, %v68_v59  ;;  %v528_v23 = vmul.f32 %v2093_v34, %v68_v59 }
  0xab   :  { %v153_v35 = vadd.f32 %v145_v26, %v101_v20  ;;  %v375_v37 = vadd.f32 %v367_v24, %v355_v19  ;;  %v548_v40 = vadd.f32 %v540_v32, %v528_v23 }
  0xad   :  { %v173_v3 = vpop.permute.xlu1 %172  ;;  %243 = vadd.xlane.f32.xlu1 %v231_v1  ;;  %v144_v1 = vmul.f32 %v2075_v25, %v2096_v36 }
  0xae   :  { %v198_v6 = vmul.f32 %v2102_v41, %v173_v3  ;;  %v388_v7 = vmul.f32 %v2104_v42, %v173_v3  ;;  %v561_v9 = vmul.f32 %v2106_v43, %v173_v3  ;;  %v99_v3 = vmul.f32 %v2087_v30, %v58_v22 }
  0xb0   :  { %v206_v10 = vadd.f32 %v198_v6, %v154_v4  ;;  %v2170_v11 = vadd.f32 %v388_v7, %v376_v5  ;;  %v2172_v12 = vadd.f32 %v561_v9, %v549_v8 }
  0xb2   :  { %v63_v17 = vpop.permute.xlu1 %62  ;;  %217 = vadd.xlane.f32.xlu0 %v206_v10  ;;  %v230_v18 = vmul.f32 %v206_v10, %v206_v10 }
  0xb3   :  { %v354_v57 = vmul.f32 %v2090_v31, %v63_v17  ;;  %v100_v63 = vmul.f32 %v2087_v30, %v63_v17  ;;  %v527_v0 = vmul.f32 %v2093_v34, %v63_v17  ;;  %v539_v31 = vmul.f32 %v2084_v29, %v2096_v36 }
  0xb4   :  { %241 = vadd.xlane.f32.xlu1 %v230_v18 }
  0xb5   :  { %v152_v6 = vadd.f32 %v144_v1, %v100_v63  ;;  %v374_v7 = vadd.f32 %v366_v58, %v354_v57  ;;  %v547_v10 = vadd.f32 %v539_v31, %v527_v0 }
  0xb7   :  { %v169_v33 = vpop.permute.xlu1 %168 }
  0xb8   :  { %v197_v38 = vmul.f32 %v2102_v41, %v169_v33  ;;  %v387_v39 = vmul.f32 %v2104_v42, %v169_v33  ;;  %v560_v44 = vmul.f32 %v2106_v43, %v169_v33 }
  0xba   :  { %v205_v47 = vadd.f32 %v197_v38, %v153_v35  ;;  %v2186_v14 = vadd.f32 %v387_v39, %v375_v37  ;;  %v2188_v49 = vadd.f32 %v560_v44, %v548_v40 }
  0xbc   :  { %v109_v51 = vpop.permute.xlu1 %108  ;;  %215 = vadd.xlane.f32.xlu0 %v205_v47  ;;  %v229_v52 = vmul.f32 %v205_v47, %v205_v47 }
  0xbd   :  { %v365_v59 = vmul.f32 %v2082_v28, %v109_v51  ;;  %v538_v60 = vmul.f32 %v2084_v29, %v109_v51  ;;  %v143_v4 = vmul.f32 %v2075_v25, %v109_v51  ;;  %v195_v29 = vmul.f32 %v2102_v41, %v161_v46 }
  0xbe   :  { %239 = vadd.xlane.f32.xlu1 %v229_v52 }
  0xbf   :  { %v373_v16 = vadd.f32 %v365_v59, %v353_v50  ;;  %v546_v2 = vadd.f32 %v538_v60, %v526_v27  ;;  %v151_v30 = vadd.f32 %v143_v4, %v99_v3 }
  0xc1   :  { %v165_v5 = vpop.permute.xlu1 %164  ;;  %v2207_v34 = vadd.f32 %v385_v53, %v373_v16  ;;  %v2209_v8 = vadd.f32 %v558_v54, %v546_v2  ;;  %v203_v20 = vadd.f32 %v195_v29, %v151_v30 }
  0xc2   :  { %v196_v28 = vmul.f32 %v2102_v41, %v165_v5  ;;  %v386_v9 = vmul.f32 %v2104_v42, %v165_v5  ;;  %v559_v17 = vmul.f32 %v2106_v43, %v165_v5 }
  0xc3   :  { %v227_v23 = vmul.f32 %v203_v20, %v203_v20 }
  0xc4   :  { %v204_v36 = vadd.f32 %v196_v28, %v152_v6  ;;  %v2215_v18 = vadd.f32 %v386_v9, %v374_v7  ;;  %v2217_v25 = vadd.f32 %v559_v17, %v547_v10  ;;  %v315_v28 = vld [vmem:[%s2716_s4 + $0x38] sm:$0xff] }
  0xc6   :  { %213 = vadd.xlane.f32.xlu0 %v204_v36  ;;  %v228_v19 = vmul.f32 %v204_v36, %v204_v36  ;;  %v314_v36 = vld [vmem:[%s2716_s4 + $0x30] sm:$0xff] }
  0xc8   :  { %237 = vadd.xlane.f32.xlu1 %v228_v19 }
  0xca   :  { %211 = vadd.xlane.f32.xlu0 %v203_v20 }
  0xce   :  { %235 = vadd.xlane.f32.xlu0 %v227_v23 }
 0x122   :  { %v224_v42 = vpop.xlane.xlu0 %223 }
 0x123   :  { %v2221_v26 = vmul.f32 0.0078125, %v224_v42  ;;  %v313_v42 = vld [vmem:[%s2716_s4 + $0x28] sm:$0xff] }
 0x125   :  { %v274_v39 = vmul.f32 %v2221_v26, %v2221_v26 }
 0x126   :  { %v226_v24 = vpop.xlane.xlu1 %225 }
 0x127   :  { %v2219_v22 = vmul.f32 0.0078125, %v226_v24 }
 0x129   :  { %v275_v41 = vmul.f32 %v2219_v22, %v2219_v22 }
 0x12a   :  { %v250_v43 = vpop.xlane.xlu1 %249  ;;  %v222_v33 = vpop.xlane.xlu0 %221 }
 0x12b   :  { %v267_v32 = vmul.f32 0.0078125, %v250_v43  ;;  %v2225_v37 = vmul.f32 0.0078125, %v222_v33 }
 0x12d   :  { %v283_v35 = vsub.f32 %v267_v32, %v275_v41  ;;  %v273_v27 = vmul.f32 %v2225_v37, %v2225_v37 }
 0x12e   :  { %v248_v38 = vpop.xlane.xlu1 %247  ;;  %v220_v46 = vpop.xlane.xlu0 %219 }
 0x12f   :  { %v291_v40 = vmax.f32 %v283_v35, 0.0  ;;  %v266_v44 = vmul.f32 0.0078125, %v248_v38  ;;  %v2231_v53 = vmul.f32 0.0078125, %v220_v46 }
 0x131   :  { %v299_v47 = vadd.f32 1e-05, %v291_v40  ;;  %v282_v50 = vsub.f32 %v266_v44, %v274_v39  ;;  %v272_v63 = vmul.f32 %v2231_v53, %v2231_v53  ;;  %v312_v39 = vld [vmem:[%s2716_s4 + $0x20] sm:$0xff] }
 0x132   :  { %v246_v51 = vpop.xlane.xlu1 %245 }
 0x133   :  { %1886 = vrsqrt.f32 %v299_v47  ;;  %v290_v52 = vmax.f32 %v282_v50, 0.0  ;;  %v265_v54 = vmul.f32 0.0078125, %v246_v51 }
 0x135   :  { %v298_v57 = vadd.f32 1e-05, %v290_v52  ;;  %v281_v59 = vsub.f32 %v265_v54, %v273_v27  ;;  %v311_v52 = vld [vmem:[%s2716_s4 + $0x18] sm:$0xff] }
 0x136   :  { %v244_v60 = vpop.xlane.xlu1 %243 }
 0x137   :  { %1888 = vrsqrt.f32 %v298_v57  ;;  %v289_v0 = vmax.f32 %v281_v59, 0.0  ;;  %v264_v58 = vmul.f32 0.0078125, %v244_v60 }
 0x139   :  { %v297_v1 = vadd.f32 1e-05, %v289_v0  ;;  %v280_v16 = vsub.f32 %v264_v58, %v272_v63  ;;  %v327_v58 = vld [vmem:[%s2717_s5 + $0x18] sm:$0xff] }
 0x13b   :  { %1890 = vrsqrt.f32 %v297_v1  ;;  %v288_v2 = vmax.f32 %v280_v16, 0.0  ;;  %v218_v31 = vpop.xlane.xlu0 %217 }
 0x13c   :  { %v255_v3 = vmul.f32 0.0078125, %v218_v31 }
 0x13d   :  { %v296_v4 = vadd.f32 1e-05, %v288_v2  ;;  %v242_v5 = vpop.xlane.xlu1 %241 }
 0x13e   :  { %v271_v6 = vmul.f32 %v255_v3, %v255_v3  ;;  %v263_v7 = vmul.f32 0.0078125, %v242_v5 }
 0x13f   :  { %1892 = vrsqrt.f32 %v296_v4 }
 0x140   :  { %v1887_v9 = vpop.eup %1886  ;;  %v279_v10 = vsub.f32 %v263_v7, %v271_v6 }
 0x141   :  { %v2238_v17 = vmul.f32 %v1887_v9, %v315_v28  ;;  %v310_v28 = vld [vmem:[%s2716_s4 + $0x10] sm:$0xff] }
 0x142   :  { %v287_v29 = vmax.f32 %v279_v10, 0.0 }
 0x143   :  { %438 = vperm.xlu1 %1884, %v2238_v17  }
 0x144   :  { %v1889_v30 = vpop.eup %1888  ;;  %v295_v19 = vadd.f32 1e-05, %v287_v29 }
 0x145   :  { %v216_v20 = vpop.xlane.xlu0 %215  ;;  %v2244_v23 = vmul.f32 %v1889_v30, %v314_v36  ;;  %v326_v36 = vld [vmem:[%s2717_s5 + $0x10] sm:$0xff] }
 0x146   :  { %1894 = vrsqrt.f32 %v295_v19  ;;  %v254_v24 = vmul.f32 0.0078125, %v216_v20 }
 0x147   :  { %v240_v43 = vpop.xlane.xlu1 %239  ;;  %433 = vperm.xlu0 %1885, %v2244_v23  }
 0x148   :  { %v1891_v41 = vpop.eup %1890  ;;  %v270_v32 = vmul.f32 %v254_v24, %v254_v24  ;;  %v262_v33 = vmul.f32 0.0078125, %v240_v43 }
 0x149   :  { %v321_v35 = vmul.f32 %v1891_v41, %v313_v42  ;;  %v309_v42 = vld [vmem:[%s2716_s4 + $0x8] sm:$0xff] }
 0x14a   :  { %v278_v38 = vsub.f32 %v262_v33, %v270_v32  ;;  %v339_v32 = vmul.f32 %v2238_v17, %v2219_v22  ;;  %v331_v33 = vld [vmem:[%s2717_s5 + $0x38] sm:$0xff] }
 0x14b   :  { %428 = vperm.xlu1 %1884, %v321_v35   ;;  %v337_v17 = vmul.f32 %v321_v35, %v2225_v37 }
 0x14c   :  { %v1893_v40 = vpop.eup %1892  ;;  %v286_v44 = vmax.f32 %v278_v38, 0.0 }
 0x14d   :  { %v320_v46 = vmul.f32 %v1893_v40, %v312_v39  ;;  %v347_v39 = vsub.f32 %v331_v33, %v339_v32 }
 0x14e   :  { %v294_v47 = vadd.f32 1e-05, %v286_v44  ;;  %v338_v44 = vmul.f32 %v2244_v23, %v2221_v26  ;;  %v328_v26 = vld [vmem:[%s2717_s5 + $0x20] sm:$0xff] }
 0x14f   :  { %423 = vperm.xlu1 %1884, %v320_v46   ;;  %v214_v50 = vpop.xlane.xlu0 %213  ;;  %v308_v23 = vld [vmem:[%s2716_s4] sm:$0xff] }
 0x150   :  { %1896 = vrsqrt.f32 %v294_v47  ;;  %v253_v27 = vmul.f32 0.0078125, %v214_v50  ;;  %v330_v47 = vld [vmem:[%s2717_s5 + $0x30] sm:$0xff]  ;;  %v329_v50 = vld [vmem:[%s2717_s5 + $0x28] sm:$0xff] }
 0x151   :  { %v238_v51 = vpop.xlane.xlu1 %237  ;;  %v346_v22 = vsub.f32 %v330_v47, %v338_v44 }
 0x152   :  { %v269_v54 = vmul.f32 %v253_v27, %v253_v27  ;;  %v261_v57 = vmul.f32 0.0078125, %v238_v51  ;;  %v336_v51 = vmul.f32 %v320_v46, %v2231_v53  ;;  %v614_v46 = vld [vmem:[%s2718_s6] sm:$0xff] }
 0x153   :  { %v1895_v59 = vpop.eup %1894  ;;  %v212_v60 = vpop.xlane.xlu0 %211  ;;  %1761 = vmatprep.mubr.msk.f32.mxu0 %vm630_vm0, %v614_v46  ;;  %1801 = vmatprep.mubr.msk.f32.mxu1 %vm630_vm0, %v614_v46 }
 0x154   :  { %v277_v63 = vsub.f32 %v261_v57, %v269_v54  ;;  %v319_v0 = vmul.f32 %v1895_v59, %v311_v52  ;;  %v252_v16 = vmul.f32 0.0078125, %v212_v60  ;;  %v344_v54 = vsub.f32 %v328_v26, %v336_v51  ;;  %v324_v57 = vld [vmem:[%s2717_s5] sm:$0xff] }
 0x156   :  { %v285_v1 = vmax.f32 %v277_v63, 0.0  ;;  %418 = vperm.xlu1 %1884, %v319_v0   ;;  %v335_v2 = vmul.f32 %v319_v0, %v255_v3  ;;  %v268_v7 = vmul.f32 %v252_v16, %v252_v16 }
 0x157   :  { %v236_v31 = vpop.xlane.xlu0 %235 }
 0x158   :  { %v293_v4 = vadd.f32 1e-05, %v285_v1  ;;  %v260_v5 = vmul.f32 0.0078125, %v236_v31  ;;  %v343_v6 = vsub.f32 %v327_v58, %v335_v2 }
 0x15a   :  { %1898 = vrsqrt.f32 %v293_v4  ;;  %466 = vperm.xlu0 %1885, %v343_v6   ;;  %v276_v9 = vsub.f32 %v260_v5, %v268_v7 }
 0x15c   :  { %v284_v30 = vmax.f32 %v276_v9, 0.0 }
 0x15d   :  { %v1897_v10 = vpop.eup %1896 }
 0x15e   :  { %v318_v29 = vmul.f32 %v1897_v10, %v310_v28  ;;  %v292_v20 = vadd.f32 1e-05, %v284_v30 }
 0x160   :  { %413 = vperm.xlu1 %1884, %v318_v29   ;;  %v334_v3 = vmul.f32 %v318_v29, %v254_v24  ;;  %1900 = vrsqrt.f32 %v292_v20  ;;  %v325_v24 = vld [vmem:[%s2717_s5 + $0x8] sm:$0xff] }
 0x162   :  { %v342_v19 = vsub.f32 %v326_v36, %v334_v3 }
 0x164   :  { %461 = vperm.xlu0 %1885, %v342_v19  }
 0x167   :  { %v1899_v43 = vpop.eup %1898 }
 0x168   :  { %v317_v41 = vmul.f32 %v1899_v43, %v309_v42 }
 0x16a   :  { %408 = vperm.xlu1 %1884, %v317_v41   ;;  %v333_v38 = vmul.f32 %v317_v41, %v253_v27  ;;  %v345_v27 = vsub.f32 %v329_v50, %v337_v17 }
 0x16c   :  { %v341_v40 = vsub.f32 %v325_v24, %v333_v38 }
 0x16d   :  { %v1901_v52 = vpop.eup %1900 }
 0x16e   :  { %486 = vperm.xlu1 %1884, %v347_v39   ;;  %456 = vperm.xlu0 %1885, %v341_v40   ;;  %v316_v37 = vmul.f32 %v1901_v52, %v308_v23 }
 0x170   :  { %v332_v35 = vmul.f32 %v316_v37, %v252_v16 }
 0x172   :  { %481 = vperm.xlu1 %1884, %v346_v22   ;;  %v340_v53 = vsub.f32 %v324_v57, %v332_v35 }
 0x176   :  { %476 = vperm.xlu1 %1884, %v345_v27  }
 0x17a   :  { %471 = vperm.xlu1 %1884, %v344_v54  }
 0x17e   :  { %403 = vperm.xlu1 %1884, %v316_v37  }
 0x182   :  { %451 = vperm.xlu1 %1884, %v340_v53  }
 0x1be   :  { %v439_v59 = vpop.permute.xlu1 %438 }
 0x1bf   :  { %v448_v16 = vmul.f32 %v439_v59, %v2131_v13  ;;  %v581_v2 = vmul.f32 %v2133_v15, %v439_v59 }
 0x1c2   :  { %v434_v31 = vpop.permute.xlu0 %433 }
 0x1c3   :  { %v447_v7 = vmul.f32 %v434_v31, %v2119_v61  ;;  %v580_v28 = vmul.f32 %v2121_v62, %v434_v31 }
 0x1c6   :  { %v429_v60 = vpop.permute.xlu1 %428 }
 0x1c7   :  { %v446_v36 = vmul.f32 %v429_v60, %v2147_v45  ;;  %v579_v42 = vmul.f32 %v2151_v48, %v429_v60 }
 0x1ca   :  { %v424_v63 = vpop.permute.xlu1 %423 }
 0x1cb   :  { %v578_v32 = vmul.f32 %v2159_v56, %v424_v63 }
 0x1d1   :  { %v419_v0 = vpop.permute.xlu1 %418 }
 0x1d2   :  { %v444_v30 = vmul.f32 %v419_v0, %v2170_v11  ;;  %v577_v61 = vmul.f32 %v2172_v12, %v419_v0  ;;  %v445_v11 = vmul.f32 %v424_v63, %v2157_v55 }
 0x1d5   :  { %v467_v9 = vpop.permute.xlu0 %466 }
 0x1d6   :  { %v492_v43 = vadd.f32 %v467_v9, %v444_v30  ;;  %v585_v33 = vadd.f32 %v577_v61, %v467_v9  ;;  %v616_v30 = vld [vmem:[%s2718_s6 + $0x10] sm:$0xff]  ;;  %v623_v61 = vld [vmem:[%s2718_s6 + $0x48] sm:$0xff] }
 0x1d8   :  { %vm500_vm5 = vcmp.ge.f32.partialorder %v492_v43, 0.0  ;;  %v508_v47 = vmul.f32 0.2, %v492_v43  ;;  %vm593_vm8 = vcmp.ge.f32.partialorder %v585_v33, 0.0  ;;  %v601_v35 = vmul.f32 0.2, %v585_v33 }
 0x1da   :  { %v609_v0 = vsel %vm593_vm8, %v585_v33, %v601_v35 }
 0x1db   :  { %v414_v58 = vpop.permute.xlu1 %413 }
 0x1dc   :  { %v443_v40 = vmul.f32 %v414_v58, %v2186_v14  ;;  %v576_v44 = vmul.f32 %v2188_v49, %v414_v58 }
 0x1df   :  { %v462_v62 = vpop.permute.xlu0 %461 }
 0x1e0   :  { %v491_v17 = vadd.f32 %v462_v62, %v443_v40  ;;  %v584_v50 = vadd.f32 %v576_v44, %v462_v62  ;;  %v625_v62 = vld [vmem:[%s2718_s6 + $0x58] sm:$0xff] }
 0x1e2   :  { %v507_v46 = vmul.f32 0.2, %v491_v17  ;;  %vm499_vm11 = vcmp.ge.f32.partialorder %v491_v17, 0.0  ;;  %v600_v63 = vmul.f32 0.2, %v584_v50  ;;  %vm592_vm12 = vcmp.ge.f32.partialorder %v584_v50, 0.0 }
 0x1e5   :  { %v409_v1 = vpop.permute.xlu1 %408 }
 0x1e6   :  { %v442_v27 = vmul.f32 %v409_v1, %v2215_v18  ;;  %v575_v51 = vmul.f32 %v2217_v25, %v409_v1  ;;  %v516_v25 = vsel %vm500_vm5, %v492_v43, %v508_v47  ;;  %v624_v43 = vld [vmem:[%s2718_s6 + $0x50] sm:$0xff] }
 0x1e9   :  { %v487_v4 = vpop.permute.xlu1 %486  ;;  %v457_v22 = vpop.permute.xlu0 %456 }
 0x1ea   :  { %v496_v5 = vadd.f32 %v487_v4, %v448_v16  ;;  %v589_v6 = vadd.f32 %v581_v2, %v487_v4  ;;  %v490_v54 = vadd.f32 %v457_v22, %v442_v27  ;;  %v583_v37 = vadd.f32 %v575_v51, %v457_v22 }
 0x1eb   :  { %v515_v4 = vsel %vm499_vm11, %v491_v17, %v507_v46 }
 0x1ec   :  { %vm504_vm1 = vcmp.ge.f32.partialorder %v496_v5, 0.0  ;;  %v512_v10 = vmul.f32 0.2, %v496_v5  ;;  %vm597_vm2 = vcmp.ge.f32.partialorder %v589_v6, 0.0  ;;  %v605_v29 = vmul.f32 0.2, %v589_v6 }
 0x1ed   :  { %v482_v13 = vpop.permute.xlu1 %481  ;;  %v506_v58 = vmul.f32 0.2, %v490_v54  ;;  %v599_v1 = vmul.f32 0.2, %v583_v37  ;;  %vm498_vm13 = vcmp.ge.f32.partialorder %v490_v54, 0.0  ;;  %vm591_vm14 = vcmp.ge.f32.partialorder %v583_v37, 0.0 }
 0x1ee   :  { %v495_v3 = vadd.f32 %v482_v13, %v447_v7  ;;  %v588_v15 = vadd.f32 %v580_v28, %v482_v13  ;;  %v520_v19 = vsel %vm504_vm1, %v496_v5, %v512_v10  ;;  %v613_v20 = vsel %vm597_vm2, %v589_v6, %v605_v29  ;;  %v617_v13 = vld [vmem:[%s2718_s6 + $0x18] sm:$0xff] }
 0x1ef   :  { %1745 = vmatprep.subr.mxu0 %v520_v19  ;;  %1785 = vmatprep.subr.mxu1 %v613_v20  ;;  %v608_v7 = vsel %vm592_vm12, %v584_v50, %v600_v63  ;;  %v607_v28 = vsel %vm591_vm14, %v583_v37, %v599_v1  ;;  %vm824_vm2 = vcmask 261120  }
 0x1f0   :  { %1746 = vmatpush3.msra.mxu0 %v520_v19  ;;  %1786 = vmatpush3.msra.mxu1 %v613_v20  ;;  %vm503_vm3 = vcmp.ge.f32.partialorder %v495_v3, 0.0  ;;  %v511_v41 = vmul.f32 0.2, %v495_v3  ;;  %vm596_vm4 = vcmp.ge.f32.partialorder %v588_v15, 0.0  ;;  %v604_v45 = vmul.f32 0.2, %v588_v15 }
 0x1f1   :  { %v477_v24 = vpop.permute.xlu1 %476  ;;  %v620_v19 = vld [vmem:[%s2718_s6 + $0x30] sm:$0xff]  ;;  %v621_v20 = vld [vmem:[%s2718_s6 + $0x38] sm:$0xff] }
 0x1f2   :  { %v494_v38 = vadd.f32 %v477_v24, %v446_v36  ;;  %v587_v48 = vadd.f32 %v579_v42, %v477_v24  ;;  %v519_v39 = vsel %vm503_vm3, %v495_v3, %v511_v41  ;;  %v612_v12 = vsel %vm596_vm4, %v588_v15, %v604_v45  ;;  %v615_v36 = vld [vmem:[%s2718_s6 + $0x8] sm:$0xff]  ;;  %v618_v3 = vld [vmem:[%s2718_s6 + $0x20] sm:$0xff] }
 0x1f3   :  { %1747 = vmatprep.subr.mxu0 %v519_v39  ;;  %1787 = vmatprep.subr.mxu1 %v612_v12  ;;  %v619_v15 = vld [vmem:[%s2718_s6 + $0x28] sm:$0xff]  ;;  %v622_v42 = vld [vmem:[%s2718_s6 + $0x40] sm:$0xff] }
 0x1f4   :  { %1748 = vmatpush3.msra.mxu0 %v519_v39  ;;  %1788 = vmatpush3.msra.mxu1 %v612_v12  ;;  %vm502_vm6 = vcmp.ge.f32.partialorder %v494_v38, 0.0  ;;  %v510_v55 = vmul.f32 0.2, %v494_v38  ;;  %vm595_vm7 = vcmp.ge.f32.partialorder %v587_v48, 0.0  ;;  %v603_v56 = vmul.f32 0.2, %v587_v48 }
 0x1f5   :  { %v472_v14 = vpop.permute.xlu1 %471  ;;  %v626_v41 = vld [vmem:[%s2718_s6 + $0x60] sm:$0xff]  ;;  %v627_v45 = vld [vmem:[%s2718_s6 + $0x68] sm:$0xff] }
 0x1f6   :  { %v493_v52 = vadd.f32 %v472_v14, %v445_v11  ;;  %v586_v49 = vadd.f32 %v578_v32, %v472_v14  ;;  %v518_v26 = vsel %vm502_vm6, %v494_v38, %v510_v55  ;;  %v611_v23 = vsel %vm595_vm7, %v587_v48, %v603_v56  ;;  %v628_v11 = vld [vmem:[%s2718_s6 + $0x70] sm:$0xff]  ;;  %v629_v32 = vld [vmem:[%s2718_s6 + $0x78] sm:$0xff] }
 0x1f7   :  { %1749 = vmatprep.subr.mxu0 %v518_v26  ;;  %1789 = vmatprep.subr.mxu1 %v611_v23 }
 0x1f8   :  { %1750 = vmatpush3.msra.mxu0 %v518_v26  ;;  %1790 = vmatpush3.msra.mxu1 %v611_v23  ;;  %vm501_vm9 = vcmp.ge.f32.partialorder %v493_v52, 0.0  ;;  %v509_v57 = vmul.f32 0.2, %v493_v52  ;;  %vm594_vm10 = vcmp.ge.f32.partialorder %v586_v49, 0.0  ;;  %v602_v53 = vmul.f32 0.2, %v586_v49 }
 0x1f9   :  { %v404_v18 = vpop.permute.xlu1 %403 }
 0x1fa   :  { %v517_v59 = vsel %vm501_vm9, %v493_v52, %v509_v57  ;;  %v610_v60 = vsel %vm594_vm10, %v586_v49, %v602_v53  ;;  %v441_v16 = vmul.f32 %v404_v18, %v2207_v34  ;;  %v574_v2 = vmul.f32 %v2209_v8, %v404_v18 }
 0x1fb   :  { %1751 = vmatprep.subr.mxu0 %v517_v59  ;;  %1791 = vmatprep.subr.mxu1 %v610_v60  ;;  %v514_v34 = vsel %vm498_vm13, %v490_v54, %v506_v58 }
 0x1fc   :  { %1752 = vmatpush3.msra.mxu0 %v517_v59  ;;  %1792 = vmatpush3.msra.mxu1 %v610_v60 }
 0x1fd   :  { %v452_v31 = vpop.permute.xlu1 %451  ;;  %1753 = vmatprep.subr.mxu0 %v516_v25  ;;  %1793 = vmatprep.subr.mxu1 %v609_v0 }
 0x1fe   :  { %v489_v5 = vadd.f32 %v452_v31, %v441_v16  ;;  %v582_v6 = vadd.f32 %v574_v2, %v452_v31  ;;  %1754 = vmatpush3.msra.mxu0 %v516_v25  ;;  %1794 = vmatpush3.msra.mxu1 %v609_v0 }
 0x1ff   :  { %1755 = vmatprep.subr.mxu0 %v515_v4  ;;  %1795 = vmatprep.subr.mxu1 %v608_v7 }
 0x200   :  { %1756 = vmatpush3.msra.mxu0 %v515_v4  ;;  %1796 = vmatpush3.msra.mxu1 %v608_v7  ;;  %vm497_vm15 = vcmp.ge.f32.partialorder %v489_v5, 0.0  ;;  %v505_v8 = vmul.f32 0.2, %v489_v5  ;;  %vm590_vm1 = vcmp.ge.f32.partialorder %v582_v6, 0.0  ;;  %v598_v9 = vmul.f32 0.2, %v582_v6 }
 0x201   :  { %1757 = vmatprep.subr.mxu0 %v514_v34  ;;  %1797 = vmatprep.subr.mxu1 %v607_v28 }
 0x202   :  { %1758 = vmatpush3.msra.mxu0 %v514_v34  ;;  %1798 = vmatpush3.msra.mxu1 %v607_v28  ;;  %v513_v10 = vsel %vm497_vm15, %v489_v5, %v505_v8  ;;  %v606_v29 = vsel %vm590_vm1, %v582_v6, %v598_v9 }
 0x203   :  { %1759 = vmatprep.subr.mxu0 %v513_v10  ;;  %1799 = vmatprep.subr.mxu1 %v606_v29 }
 0x204   :  { %1760 = vmatpush3.msra.mxu0 %v513_v10  ;;  %1800 = vmatpush3.msra.mxu1 %v606_v29 }
 0x205   :  { %1762 = vmatmul.mubr.msk.f32.vlgmr.msra.gmra.mxu0 %vm630_vm0, %v615_v36  ;;  %1802 = vmatmul.mubr.msk.f32.vlgmr.msra.gmra.mxu1 %vm630_vm0, %v615_v36 }
 0x206   :  { %1764 = vmatprep.mubr.msk.f32.mxu0 %vm630_vm0, %v616_v30  ;;  %1804 = vmatprep.mubr.msk.f32.mxu1 %vm630_vm0, %v616_v30 }
 0x209   :  { %1765 = vmatmul.mubr.msk.f32.gmra.mxu0 %vm630_vm0, %v617_v13  ;;  %1805 = vmatmul.mubr.msk.f32.gmra.mxu1 %vm630_vm0, %v617_v13 }
 0x20a   :  { %1767 = vmatprep.mubr.msk.f32.mxu0 %vm630_vm0, %v618_v3  ;;  %1807 = vmatprep.mubr.msk.f32.mxu1 %vm630_vm0, %v618_v3 }
 0x20d   :  { %1768 = vmatmul.mubr.msk.f32.gmra.mxu0 %vm630_vm0, %v619_v15  ;;  %1808 = vmatmul.mubr.msk.f32.gmra.mxu1 %vm630_vm0, %v619_v15 }
 0x20e   :  { %1770 = vmatprep.mubr.msk.f32.mxu0 %vm630_vm0, %v620_v19  ;;  %1810 = vmatprep.mubr.msk.f32.mxu1 %vm630_vm0, %v620_v19 }
 0x211   :  { %1771 = vmatmul.mubr.msk.f32.gmra.mxu0 %vm630_vm0, %v621_v20  ;;  %1811 = vmatmul.mubr.msk.f32.gmra.mxu1 %vm630_vm0, %v621_v20 }
 0x212   :  { %1773 = vmatprep.mubr.msk.f32.mxu0 %vm630_vm0, %v622_v42  ;;  %1813 = vmatprep.mubr.msk.f32.mxu1 %vm630_vm0, %v622_v42 }
 0x215   :  { %1774 = vmatmul.mubr.msk.f32.gmra.mxu0 %vm630_vm0, %v623_v61  ;;  %1814 = vmatmul.mubr.msk.f32.gmra.mxu1 %vm630_vm0, %v623_v61 }
 0x216   :  { %1776 = vmatprep.mubr.msk.f32.mxu0 %vm630_vm0, %v624_v43  ;;  %1816 = vmatprep.mubr.msk.f32.mxu1 %vm630_vm0, %v624_v43 }
 0x219   :  { %1777 = vmatmul.mubr.msk.f32.gmra.mxu0 %vm630_vm0, %v625_v62  ;;  %1817 = vmatmul.mubr.msk.f32.gmra.mxu1 %vm630_vm0, %v625_v62 }
 0x21a   :  { %1779 = vmatprep.mubr.msk.f32.mxu0 %vm630_vm0, %v626_v41  ;;  %1819 = vmatprep.mubr.msk.f32.mxu1 %vm630_vm0, %v626_v41 }
 0x21d   :  { %1780 = vmatmul.mubr.msk.f32.gmra.mxu0 %vm630_vm0, %v627_v45  ;;  %1820 = vmatmul.mubr.msk.f32.gmra.mxu1 %vm630_vm0, %v627_v45 }
 0x21e   :  { %1782 = vmatprep.mubr.msk.f32.mxu0 %vm630_vm0, %v628_v11  ;;  %1822 = vmatprep.mubr.msk.f32.mxu1 %vm630_vm0, %v628_v11 }
 0x221   :  { %1783 = vmatmul.mubr.msk.f32.gmra.mxu0 %vm630_vm0, %v629_v32  ;;  %1823 = vmatmul.mubr.msk.f32.gmra.mxu1 %vm630_vm0, %v629_v32  ;;  %vm1966_vm0 = vmmov 0  }
 0x2c5   :  { %v2395_v33 = vpop.f32.mrf.mxu0 }
 0x2c6   :  { %v828_v41 = vsel %vm824_vm2, %v2395_v33, 0.0  ;;  %v874_v45 = vmul.f32 %v2395_v33, %v2395_v33 }
 0x2c7   :  { %v2397_v24 = vpop.f32.mrf.mxu0 }
 0x2c8   :  { %v873_v38 = vmul.f32 %v2397_v24, %v2397_v24  ;;  %v825_v32 = vsel %vm824_vm2, %v2397_v24, 0.0 }
 0x2c9   :  { %v2401_v48 = vpop.f32.mrf.mxu0 }
 0x2ca   :  { %v2404_v39 = vsel %vm824_vm2, %v873_v38, 0.0  ;;  %v834_v19 = vsel %vm824_vm2, %v2401_v48, 0.0  ;;  %v876_v20 = vmul.f32 %v2401_v48, %v2401_v48  ;;  %v892_v38 = vsel %vm824_vm2, %v874_v45, 0.0 }
 0x2cb   :  { %v2406_v12 = vpop.f32.mrf.mxu0 }
 0x2cc   :  { %v831_v61 = vsel %vm824_vm2, %v2406_v12, 0.0  ;;  %v875_v43 = vmul.f32 %v2406_v12, %v2406_v12  ;;  %v898_v62 = vsel %vm824_vm2, %v876_v20, 0.0 }
 0x2cd   :  { %v1769_v40 = vpop.f32.mrf.mxu0 }
 0x2ce   :  { %v840_v29 = vsel %vm824_vm2, %v1769_v40, 0.0  ;;  %v878_v36 = vmul.f32 %v1769_v40, %v1769_v40  ;;  %v895_v11 = vsel %vm824_vm2, %v875_v43, 0.0 }
 0x2cf   :  { %v2408_v44 = vpop.f32.mrf.mxu0 }
 0x2d0   :  { %v837_v13 = vsel %vm824_vm2, %v2408_v44, 0.0  ;;  %v877_v3 = vmul.f32 %v2408_v44, %v2408_v44  ;;  %v904_v15 = vsel %vm824_vm2, %v878_v36, 0.0 }
 0x2d1   :  { %v1772_v47 = vpop.f32.mrf.mxu0 }
 0x2d2   :  { %v846_v22 = vsel %vm824_vm2, %v1772_v47, 0.0  ;;  %v880_v34 = vmul.f32 %v1772_v47, %v1772_v47  ;;  %v901_v42 = vsel %vm824_vm2, %v877_v3, 0.0 }
 0x2d3   :  { %847 = vadd.xlane.f32.xlu0 %v846_v22  ;;  %v775_v55 = vpop.f32.mrf.mxu0 }
 0x2d4   :  { %v843_v8 = vsel %vm824_vm2, %v775_v55, 0.0  ;;  %v879_v9 = vmul.f32 %v775_v55, %v775_v55  ;;  %v910_v10 = vsel %vm824_vm2, %v880_v34, 0.0 }
 0x2d5   :  { %v1775_v56 = vpop.f32.mrf.mxu0 }
 0x2d6   :  { %v882_v17 = vmul.f32 %v1775_v56, %v1775_v56  ;;  %v852_v50 = vsel %vm824_vm2, %v1775_v56, 0.0  ;;  %v907_v30 = vsel %vm824_vm2, %v879_v9, 0.0 }
 0x2d7   :  { %853 = vadd.xlane.f32.xlu0 %v852_v50  ;;  %v785_v27 = vpop.f32.mrf.mxu0 }
 0x2d8   :  { %v881_v51 = vmul.f32 %v785_v27, %v785_v27  ;;  %v916_v14 = vsel %vm824_vm2, %v882_v17, 0.0  ;;  %v849_v49 = vsel %vm824_vm2, %v785_v27, 0.0 }
 0x2d9   :  { %917 = vadd.xlane.f32.xlu1 %v916_v14  ;;  %v1778_v52 = vpop.f32.mrf.mxu0 }
 0x2da   :  { %v884_v26 = vmul.f32 %v1778_v52, %v1778_v52  ;;  %v913_v23 = vsel %vm824_vm2, %v881_v51, 0.0  ;;  %v858_v54 = vsel %vm824_vm2, %v1778_v52, 0.0 }
 0x2db   :  { %850 = vadd.xlane.f32.xlu0 %v849_v49  ;;  %v795_v37 = vpop.f32.mrf.mxu0 }
 0x2dc   :  { %v922_v35 = vsel %vm824_vm2, %v884_v26, 0.0  ;;  %v883_v57 = vmul.f32 %v795_v37, %v795_v37  ;;  %v855_v18 = vsel %vm824_vm2, %v795_v37, 0.0 }
 0x2dd   :  { %914 = vadd.xlane.f32.xlu1 %v913_v23  ;;  %v1781_v53 = vpop.f32.mrf.mxu0 }
 0x2de   :  { %v886_v25 = vmul.f32 %v1781_v53, %v1781_v53  ;;  %v919_v46 = vsel %vm824_vm2, %v883_v57, 0.0  ;;  %v864_v59 = vsel %vm824_vm2, %v1781_v53, 0.0 }
 0x2df   :  { %859 = vadd.xlane.f32.xlu0 %v858_v54  ;;  %v805_v60 = vpop.f32.mrf.mxu0 }
 0x2e0   :  { %v928_v63 = vsel %vm824_vm2, %v886_v25, 0.0  ;;  %v885_v0 = vmul.f32 %v805_v60, %v805_v60  ;;  %v861_v1 = vsel %vm824_vm2, %v805_v60, 0.0 }
 0x2e1   :  { %923 = vadd.xlane.f32.xlu1 %v922_v35  ;;  %v1784_v58 = vpop.f32.mrf.mxu0 }
 0x2e2   :  { %v925_v16 = vsel %vm824_vm2, %v885_v0, 0.0  ;;  %v870_v2 = vsel %vm824_vm2, %v1784_v58, 0.0  ;;  %v888_v4 = vmul.f32 %v1784_v58, %v1784_v58 }
 0x2e3   :  { %856 = vadd.xlane.f32.xlu0 %v855_v18  ;;  %v815_v31 = vpop.f32.mrf.mxu0 }
 0x2e4   :  { %v887_v5 = vmul.f32 %v815_v31, %v815_v31  ;;  %v867_v6 = vsel %vm824_vm2, %v815_v31, 0.0  ;;  %v934_v7 = vsel %vm824_vm2, %v888_v4, 0.0 }
 0x2e5   :  { %920 = vadd.xlane.f32.xlu1 %v919_v46 }
 0x2e6   :  { %v931_v28 = vsel %vm824_vm2, %v887_v5, 0.0 }
 0x2e7   :  { %865 = vadd.xlane.f32.xlu0 %v864_v59 }
 0x2e9   :  { %929 = vadd.xlane.f32.xlu1 %v928_v63 }
 0x2eb   :  { %862 = vadd.xlane.f32.xlu0 %v861_v1 }
 0x2ed   :  { %926 = vadd.xlane.f32.xlu1 %v925_v16 }
 0x2ef   :  { %871 = vadd.xlane.f32.xlu0 %v870_v2 }
 0x2f1   :  { %868 = vadd.xlane.f32.xlu1 %v867_v6 }
 0x2f3   :  { %935 = vadd.xlane.f32.xlu0 %v934_v7 }
 0x2f5   :  { %932 = vadd.xlane.f32.xlu1 %v931_v28  ;;  %v1059_v28 = vld [vmem:[%s2719_s7 + $0x48] sm:$0xff] }
 0x2f7   :  { %844 = vadd.xlane.f32.xlu0 %v843_v8 }
 0x2f9   :  { %911 = vadd.xlane.f32.xlu1 %v910_v10 }
 0x2fb   :  { %841 = vadd.xlane.f32.xlu0 %v840_v29 }
 0x2fd   :  { %908 = vadd.xlane.f32.xlu1 %v907_v30 }
 0x2ff   :  { %838 = vadd.xlane.f32.xlu0 %v837_v13 }
 0x301   :  { %905 = vadd.xlane.f32.xlu1 %v904_v15 }
 0x303   :  { %835 = vadd.xlane.f32.xlu0 %v834_v19  ;;  %v1058_v19 = vld [vmem:[%s2719_s7 + $0x40] sm:$0xff] }
 0x305   :  { %902 = vadd.xlane.f32.xlu1 %v901_v42 }
 0x307   :  { %832 = vadd.xlane.f32.xlu0 %v831_v61  ;;  %v1091_v61 = vld [vmem:[%s2720_s8 + $0x48] sm:$0xff] }
 0x309   :  { %899 = vadd.xlane.f32.xlu1 %v898_v62 }
 0x30b   :  { %829 = vadd.xlane.f32.xlu0 %v828_v41 }
 0x30d   :  { %896 = vadd.xlane.f32.xlu1 %v895_v11 }
 0x30f   :  { %826 = vadd.xlane.f32.xlu0 %v825_v32 }
 0x311   :  { %893 = vadd.xlane.f32.xlu1 %v892_v38 }
 0x313   :  { %890 = vadd.xlane.f32.xlu0 %v2404_v39 }
 0x35c   :  { %v2455_v48 = vpop.xlane.xlu0 %847 }
 0x360   :  { %v854_v12 = vpop.xlane.xlu0 %853 }
 0x361   :  { %v947_v40 = vmul.f32 0.03125, %v854_v12  ;;  %v1090_v12 = vld [vmem:[%s2720_s8 + $0x40] sm:$0xff] }
 0x362   :  { %v918_v44 = vpop.xlane.xlu1 %917 }
 0x363   :  { %v979_v47 = vmul.f32 %v947_v40, %v947_v40  ;;  %v963_v22 = vmul.f32 0.03125, %v918_v44  ;;  %v2501_v44 = vmul.f32 0.03125, %v2455_v48 }
 0x364   :  { %v851_v33 = vpop.xlane.xlu0 %850 }
 0x365   :  { %v995_v55 = vsub.f32 %v963_v22, %v979_v47  ;;  %v2457_v56 = vmul.f32 0.03125, %v851_v33 }
 0x366   :  { %v915_v17 = vpop.xlane.xlu1 %914 }
 0x367   :  { %v1011_v50 = vmax.f32 %v995_v55, 0.0  ;;  %v978_v24 = vmul.f32 %v2457_v56, %v2457_v56  ;;  %v962_v27 = vmul.f32 0.03125, %v915_v17 }
 0x368   :  { %v860_v51 = vpop.xlane.xlu0 %859 }
 0x369   :  { %v1027_v14 = vadd.f32 1e-05, %v1011_v50  ;;  %v994_v39 = vsub.f32 %v962_v27, %v978_v24  ;;  %v2461_v52 = vmul.f32 0.03125, %v860_v51 }
 0x36a   :  { %v924_v49 = vpop.xlane.xlu1 %923 }
 0x36b   :  { %1902 = vrsqrt.f32 %v1027_v14  ;;  %v1010_v26 = vmax.f32 %v994_v39, 0.0  ;;  %v981_v23 = vmul.f32 %v2461_v52, %v2461_v52  ;;  %v965_v54 = vmul.f32 0.03125, %v924_v49  ;;  %v1093_v49 = vld [vmem:[%s2720_s8 + $0x58] sm:$0xff] }
 0x36c   :  { %v857_v37 = vpop.xlane.xlu0 %856  ;;  %v977_v14 = vmul.f32 %v2501_v44, %v2501_v44 }
 0x36d   :  { %v1026_v35 = vadd.f32 1e-05, %v1010_v26  ;;  %v997_v57 = vsub.f32 %v965_v54, %v981_v23  ;;  %v2465_v53 = vmul.f32 0.03125, %v857_v37  ;;  %v1060_v26 = vld [vmem:[%s2719_s7 + $0x50] sm:$0xff] }
 0x36e   :  { %v921_v18 = vpop.xlane.xlu1 %920 }
 0x36f   :  { %1904 = vrsqrt.f32 %v1026_v35  ;;  %v1013_v25 = vmax.f32 %v997_v57, 0.0  ;;  %v980_v46 = vmul.f32 %v2465_v53, %v2465_v53  ;;  %v964_v59 = vmul.f32 0.03125, %v921_v18 }
 0x370   :  { %v866_v60 = vpop.xlane.xlu0 %865 }
 0x371   :  { %v1029_v63 = vadd.f32 1e-05, %v1013_v25  ;;  %v996_v0 = vsub.f32 %v964_v59, %v980_v46  ;;  %v2469_v58 = vmul.f32 0.03125, %v866_v60  ;;  %v1063_v60 = vld [vmem:[%s2719_s7 + $0x68] sm:$0xff] }
 0x372   :  { %v930_v1 = vpop.xlane.xlu1 %929 }
 0x373   :  { %1906 = vrsqrt.f32 %v1029_v63  ;;  %v1012_v16 = vmax.f32 %v996_v0, 0.0  ;;  %v983_v2 = vmul.f32 %v2469_v58, %v2469_v58  ;;  %v967_v31 = vmul.f32 0.03125, %v930_v1 }
 0x374   :  { %v863_v4 = vpop.xlane.xlu0 %862 }
 0x375   :  { %v1028_v5 = vadd.f32 1e-05, %v1012_v16  ;;  %v999_v6 = vsub.f32 %v967_v31, %v983_v2  ;;  %v2473_v7 = vmul.f32 0.03125, %v863_v4 }
 0x376   :  { %v927_v34 = vpop.xlane.xlu1 %926 }
 0x377   :  { %1908 = vrsqrt.f32 %v1028_v5  ;;  %v1015_v8 = vmax.f32 %v999_v6, 0.0  ;;  %v982_v9 = vmul.f32 %v2473_v7, %v2473_v7  ;;  %v966_v10 = vmul.f32 0.03125, %v927_v34 }
 0x378   :  { %v1903_v29 = vpop.eup %1902  ;;  %v2480_v36 = vpop.xlane.xlu0 %871 }
 0x379   :  { %v1031_v30 = vadd.f32 1e-05, %v1015_v8  ;;  %v998_v13 = vsub.f32 %v966_v10, %v982_v9  ;;  %v2482_v3 = vmul.f32 %v1903_v29, %v1059_v28 }
 0x37a   :  { %v869_v15 = vpop.xlane.xlu1 %868 }
 0x37b   :  { %1910 = vrsqrt.f32 %v1031_v30  ;;  %v1014_v20 = vmax.f32 %v998_v13, 0.0  ;;  %v2487_v42 = vmul.f32 0.03125, %v869_v15  ;;  %v1107_v41 = vmul.f32 %v2482_v3, %v947_v40  ;;  %v1061_v40 = vld [vmem:[%s2719_s7 + $0x58] sm:$0xff]  ;;  %v1095_v30 = vld [vmem:[%s2720_s8 + $0x68] sm:$0xff] }
 0x37c   :  { %v1905_v43 = vpop.eup %1904  ;;  %v2492_v62 = vpop.xlane.xlu0 %935 }
 0x37d   :  { %v1030_v45 = vadd.f32 1e-05, %v1014_v20  ;;  %v2495_v11 = vmul.f32 %v1905_v43, %v1058_v19  ;;  %v1123_v38 = vsub.f32 %v1091_v61, %v1107_v41  ;;  %v984_v47 = vmul.f32 %v2487_v42, %v2487_v42 }
 0x37e   :  { %v933_v32 = vpop.xlane.xlu1 %932  ;;  %v2550_v61 = vmul.f32 0.03125, %v2480_v36 }
 0x37f   :  { %v968_v22 = vmul.f32 0.03125, %v933_v32  ;;  %v1106_v33 = vmul.f32 %v2495_v11, %v2457_v56  ;;  %1418 = vperm.xlu0 %1885, %v1123_v38   ;;  %1912 = vrsqrt.f32 %v1030_v45  ;;  %v1062_v32 = vld [vmem:[%s2719_s7 + $0x60] sm:$0xff] }
 0x380   :  { %v1907_v55 = vpop.eup %1906  ;;  %v845_v17 = vpop.xlane.xlu0 %844 }
 0x381   :  { %v1000_v50 = vsub.f32 %v968_v22, %v984_v47  ;;  %v1122_v24 = vsub.f32 %v1090_v12, %v1106_v33  ;;  %v2510_v27 = vmul.f32 0.03125, %v845_v17  ;;  %v2512_v51 = vmul.f32 %v1907_v55, %v1061_v40 }
 0x382   :  { %v912_v48 = vpop.xlane.xlu1 %911  ;;  %v969_v47 = vmul.f32 0.03125, %v2492_v62  ;;  %v985_v55 = vmul.f32 %v2550_v61, %v2550_v61 }
 0x383   :  { %v1016_v39 = vmax.f32 %v1000_v50, 0.0  ;;  %v961_v56 = vmul.f32 0.03125, %v912_v48  ;;  %1413 = vperm.xlu0 %1885, %v1122_v24   ;;  %v1109_v37 = vmul.f32 %v2512_v51, %v2461_v52  ;;  %v976_v18 = vmul.f32 %v2510_v27, %v2510_v27  ;;  %v1092_v52 = vld [vmem:[%s2720_s8 + $0x50] sm:$0xff] }
 0x384   :  { %v1909_v23 = vpop.eup %1908  ;;  %v842_v54 = vpop.xlane.xlu0 %841  ;;  %v1064_v24 = vld [vmem:[%s2719_s7 + $0x70] sm:$0xff] }
 0x385   :  { %v1032_v35 = vadd.f32 1e-05, %v1016_v39  ;;  %v993_v57 = vsub.f32 %v961_v56, %v977_v14  ;;  %v1125_v46 = vsub.f32 %v1093_v49, %v1109_v37  ;;  %v2526_v59 = vmul.f32 %v1909_v23, %v1060_v26 }
 0x386   :  { %v909_v25 = vpop.xlane.xlu1 %908  ;;  %v2531_v0 = vmul.f32 0.03125, %v842_v54  ;;  %v1001_v56 = vsub.f32 %v969_v47, %v985_v55 }
 0x387   :  { %1914 = vrsqrt.f32 %v1032_v35  ;;  %v1009_v63 = vmax.f32 %v993_v57, 0.0  ;;  %v960_v1 = vmul.f32 0.03125, %v909_v25  ;;  %1428 = vperm.xlu0 %1885, %v1125_v46   ;;  %v1108_v31 = vmul.f32 %v2526_v59, %v2465_v53  ;;  %v1057_v25 = vld [vmem:[%s2719_s7 + $0x38] sm:$0xff] }
 0x388   :  { %v1911_v16 = vpop.eup %1910  ;;  %v839_v2 = vpop.xlane.xlu0 %838  ;;  %v975_v9 = vmul.f32 %v2531_v0, %v2531_v0 }
 0x389   :  { %v1025_v4 = vadd.f32 1e-05, %v1009_v63  ;;  %v992_v5 = vsub.f32 %v960_v1, %v976_v18  ;;  %v2538_v6 = vmul.f32 %v1911_v16, %v1063_v60  ;;  %v2540_v34 = vmul.f32 0.03125, %v839_v2  ;;  %v1094_v18 = vld [vmem:[%s2720_s8 + $0x60] sm:$0xff] }
 0x38a   :  { %v906_v28 = vpop.xlane.xlu1 %905  ;;  %v1124_v8 = vsub.f32 %v1092_v52, %v1108_v31 }
 0x38b   :  { %1916 = vrsqrt.f32 %v1025_v4  ;;  %v1008_v10 = vmax.f32 %v992_v5, 0.0  ;;  %v959_v29 = vmul.f32 0.03125, %v906_v28  ;;  %v1111_v13 = vmul.f32 %v2538_v6, %v2469_v58  ;;  %v1096_v5 = vld [vmem:[%s2720_s8 + $0x70] sm:$0xff] }
 0x38c   :  { %1423 = vperm.xlu0 %1885, %v1124_v8   ;;  %v836_v53 = vpop.xlane.xlu0 %835  ;;  %v1913_v20 = vpop.eup %1912  ;;  %v974_v43 = vmul.f32 %v2540_v34, %v2540_v34  ;;  %v1056_v8 = vld [vmem:[%s2719_s7 + $0x30] sm:$0xff] }
 0x38d   :  { %v1024_v15 = vadd.f32 1e-05, %v1008_v10  ;;  %v991_v19 = vsub.f32 %v959_v29, %v975_v9  ;;  %v1127_v45 = vsub.f32 %v1095_v30, %v1111_v13  ;;  %v2557_v12 = vmul.f32 0.03125, %v836_v53 }
 0x38e   :  { %v903_v41 = vpop.xlane.xlu1 %902  ;;  %v2560_v40 = vmul.f32 %v1913_v20, %v1062_v32 }
 0x38f   :  { %1918 = vrsqrt.f32 %v1024_v15  ;;  %v1007_v38 = vmax.f32 %v991_v19, 0.0  ;;  %v958_v58 = vmul.f32 0.03125, %v903_v41  ;;  %v973_v62 = vmul.f32 %v2557_v12, %v2557_v12  ;;  %v1055_v41 = vld [vmem:[%s2719_s7 + $0x28] sm:$0xff] }
 0x390   :  { %1438 = vperm.xlu0 %1885, %v1127_v45   ;;  %v833_v22 = vpop.xlane.xlu0 %832  ;;  %v1110_v37 = vmul.f32 %v2560_v40, %v2473_v7  ;;  %v1017_v7 = vmax.f32 %v1001_v56, 0.0  ;;  %v1052_v56 = vld [vmem:[%s2719_s7 + $0x10] sm:$0xff] }
 0x391   :  { %v1023_v36 = vadd.f32 1e-05, %v1007_v38  ;;  %v990_v33 = vsub.f32 %v958_v58, %v974_v43  ;;  %v2564_v17 = vmul.f32 0.03125, %v833_v22  ;;  %v1089_v43 = vld [vmem:[%s2720_s8 + $0x38] sm:$0xff]  ;;  %v1088_v22 = vld [vmem:[%s2720_s8 + $0x30] sm:$0xff] }
 0x392   :  { %v900_v50 = vpop.xlane.xlu1 %899  ;;  %v1126_v31 = vsub.f32 %v1094_v18, %v1110_v37  ;;  %v1033_v30 = vadd.f32 1e-05, %v1017_v7  ;;  %v1084_v7 = vld [vmem:[%s2720_s8 + $0x10] sm:$0xff] }
 0x393   :  { %1920 = vrsqrt.f32 %v1023_v36  ;;  %v1006_v48 = vmax.f32 %v990_v33, 0.0  ;;  %v957_v14 = vmul.f32 0.03125, %v900_v50  ;;  %v972_v35 = vmul.f32 %v2564_v17, %v2564_v17  ;;  %v1054_v36 = vld [vmem:[%s2719_s7 + $0x20] sm:$0xff] }
 0x394   :  { %v1915_v39 = vpop.eup %1914  ;;  %v830_v49 = vpop.xlane.xlu0 %829 }
 0x395   :  { %v1022_v26 = vadd.f32 1e-05, %v1006_v48  ;;  %v989_v23 = vsub.f32 %v957_v14, %v973_v62  ;;  %v1080_v54 = vmul.f32 %v1915_v39, %v1064_v24  ;;  %v2581_v60 = vmul.f32 0.03125, %v830_v49  ;;  %v1053_v24 = vld [vmem:[%s2719_s7 + $0x18] sm:$0xff] }
 0x396   :  { %v897_v57 = vpop.xlane.xlu1 %896 }
 0x397   :  { %1922 = vrsqrt.f32 %v1022_v26  ;;  %v1005_v46 = vmax.f32 %v989_v23, 0.0  ;;  %v956_v63 = vmul.f32 0.03125, %v897_v57  ;;  %1347 = vperm.xlu0 %1885, %v1080_v54   ;;  %v1112_v52 = vmul.f32 %v1080_v54, %v2487_v42 }
 0x398   :  { %v1917_v1 = vpop.eup %1916  ;;  %v971_v9 = vmul.f32 %v2581_v60, %v2581_v60  ;;  %v827_v48 = vpop.xlane.xlu0 %826 }
 0x399   :  { %v1021_v16 = vadd.f32 1e-05, %v1005_v46  ;;  %v988_v2 = vsub.f32 %v956_v63, %v972_v35  ;;  %v1073_v4 = vmul.f32 %v1917_v1, %v1057_v25  ;;  %v1128_v53 = vsub.f32 %v1096_v5, %v1112_v52  ;;  %v1085_v35 = vld [vmem:[%s2720_s8 + $0x18] sm:$0xff] }
 0x39a   :  { %v894_v28 = vpop.xlane.xlu1 %893  ;;  %v938_v57 = vmul.f32 0.03125, %v827_v48 }
 0x39b   :  { %1924 = vrsqrt.f32 %v1021_v16  ;;  %v1004_v10 = vmax.f32 %v988_v2, 0.0  ;;  %v955_v29 = vmul.f32 0.03125, %v894_v28  ;;  %1433 = vperm.xlu0 %1885, %v1126_v31   ;;  %1312 = vperm.xlu1 %1884, %v1073_v4   ;;  %v1105_v19 = vmul.f32 %v1073_v4, %v2501_v44  ;;  %v1097_v4 = vld [vmem:[%s2720_s8 + $0x78] sm:$0xff] }
 0x39c   :  { %v1919_v42 = vpop.eup %1918  ;;  %v891_v37 = vpop.xlane.xlu0 %890  ;;  %v970_v52 = vmul.f32 %v938_v57, %v938_v57 }
 0x39d   :  { %v1020_v13 = vadd.f32 1e-05, %v1004_v10  ;;  %v987_v15 = vsub.f32 %v955_v29, %v971_v9  ;;  %v2593_v20 = vmul.f32 %v1919_v42, %v1056_v8  ;;  %v1121_v58 = vsub.f32 %v1089_v43, %v1105_v19  ;;  %v1082_v42 = vld [vmem:[%s2720_s8] sm:$0xff] }
 0x39e   :  { %v954_v25 = vmul.f32 0.03125, %v891_v37  ;;  %v1965_v9 = vmov 0.0  }
 0x39f   :  { %1926 = vrsqrt.f32 %v1020_v13  ;;  %v1003_v45 = vmax.f32 %v987_v15, 0.0  ;;  %1443 = vperm.xlu0 %1885, %v1128_v53   ;;  %1322 = vperm.xlu1 %1884, %v2482_v3   ;;  %v1104_v44 = vmul.f32 %v2593_v20, %v2510_v27  ;;  %v1087_v27 = vld [vmem:[%s2720_s8 + $0x28] sm:$0xff]  ;;  %v2660_v53 = vpop.f32.mrf.mxu1 }
 0x3a0   :  { %v1921_v32 = vpop.eup %1920  ;;  %1928 = vrsqrt.f32 %v1033_v30  ;;  %v986_v16 = vsub.f32 %v954_v25, %v970_v52  ;;  %1825 = vmatprep.subr.mxu0 %v1965_v9  ;;  %1857 = vmatprep.mubr.msk.f32.mxu0 %vm1966_vm0, %v1965_v9 }
 0x3a1   :  { %v1019_v38 = vadd.f32 1e-05, %v1003_v45  ;;  %v1071_v47 = vmul.f32 %v1921_v32, %v1055_v41  ;;  %v1120_v33 = vsub.f32 %v1088_v22, %v1104_v44  ;;  %v2662_v13 = vpop.f32.mrf.mxu1 }
 0x3a2   :  { %v1002_v5 = vmax.f32 %v986_v16, 0.0 }
 0x3a3   :  { %1930 = vrsqrt.f32 %v1019_v38  ;;  %1317 = vperm.xlu1 %1884, %v2495_v11   ;;  %1408 = vperm.xlu0 %1885, %v1121_v58   ;;  %v1103_v55 = vmul.f32 %v1071_v47, %v2531_v0  ;;  %v1086_v0 = vld [vmem:[%s2720_s8 + $0x20] sm:$0xff]  ;;  %v2664_v15 = vpop.f32.mrf.mxu1 }
 0x3a4   :  { %v1923_v3 = vpop.eup %1922  ;;  %v1018_v8 = vadd.f32 1e-05, %v1002_v5 }
 0x3a5   :  { %v1070_v50 = vmul.f32 %v1923_v3, %v1054_v36  ;;  %v1119_v11 = vsub.f32 %v1087_v27, %v1103_v55 }
 0x3a6   :  { %1932 = vrsqrt.f32 %v1018_v8 }
 0x3a7   :  { %1332 = vperm.xlu1 %1884, %v2512_v51   ;;  %1403 = vperm.xlu0 %1885, %v1120_v33   ;;  %v1102_v14 = vmul.f32 %v1070_v50, %v2540_v34  ;;  %v1065_v34 = vld [vmem:[%s2719_s7 + $0x78] sm:$0xff] }
 0x3a8   :  { %v1925_v62 = vpop.eup %1924 }
 0x3a9   :  { %v1069_v39 = vmul.f32 %v1925_v62, %v1053_v24  ;;  %v1118_v26 = vsub.f32 %v1086_v0, %v1102_v14 }
 0x3ab   :  { %1327 = vperm.xlu1 %1884, %v2526_v59   ;;  %1398 = vperm.xlu0 %1885, %v1119_v11   ;;  %v1101_v23 = vmul.f32 %v1069_v39, %v2557_v12  ;;  %v1051_v59 = vld [vmem:[%s2719_s7 + $0x8] sm:$0xff] }
 0x3ac   :  { %v1927_v49 = vpop.eup %1926 }
 0x3ad   :  { %v1929_v51 = vpop.eup %1928  ;;  %v1068_v54 = vmul.f32 %v1927_v49, %v1052_v56  ;;  %v1117_v46 = vsub.f32 %v1085_v35, %v1101_v23 }
 0x3ae   :  { %v1081_v12 = vmul.f32 %v1929_v51, %v1065_v34 }
 0x3af   :  { %1342 = vperm.xlu1 %1884, %v2538_v6   ;;  %1393 = vperm.xlu0 %1885, %v1118_v26   ;;  %v1100_v63 = vmul.f32 %v1068_v54, %v2564_v17  ;;  %v1083_v17 = vld [vmem:[%s2720_s8 + $0x8] sm:$0xff] }
 0x3b0   :  { %v1931_v18 = vpop.eup %1930  ;;  %v1113_v6 = vmul.f32 %v1081_v12, %v2550_v61 }
 0x3b1   :  { %v1067_v1 = vmul.f32 %v1931_v18, %v1051_v59  ;;  %v1116_v2 = vsub.f32 %v1084_v7, %v1100_v63 }
 0x3b2   :  { %v1129_v28 = vsub.f32 %v1097_v4, %v1113_v6 }
 0x3b3   :  { %1337 = vperm.xlu1 %1884, %v2560_v40   ;;  %1388 = vperm.xlu0 %1885, %v1117_v46   ;;  %v1099_v31 = vmul.f32 %v1067_v1, %v2581_v60  ;;  %v1933_v61 = vpop.eup %1932  ;;  %v1050_v60 = vld [vmem:[%s2719_s7] sm:$0xff] }
 0x3b4   :  { %v1066_v10 = vmul.f32 %v1933_v61, %v1050_v60 }
 0x3b5   :  { %v1115_v40 = vsub.f32 %v1083_v17, %v1099_v31 }
 0x3b6   :  { %v1098_v29 = vmul.f32 %v1066_v10, %v938_v57 }
 0x3b7   :  { %1352 = vperm.xlu1 %1884, %v1081_v12   ;;  %1383 = vperm.xlu0 %1885, %v1116_v2  }
 0x3b8   :  { %v1114_v30 = vsub.f32 %v1082_v42, %v1098_v29 }
 0x3bb   :  { %1448 = vperm.xlu1 %1884, %v1129_v28   ;;  %1378 = vperm.xlu0 %1885, %v1115_v40  }
 0x3bf   :  { %1307 = vperm.xlu1 %1884, %v2593_v20   ;;  %v2668_v20 = vpop.f32.mrf.mxu1 }
 0x3c1   :  { %v2670_v43 = vpop.f32.mrf.mxu1 }
 0x3c3   :  { %1302 = vperm.xlu1 %1884, %v1071_v47   ;;  %v2674_v45 = vpop.f32.mrf.mxu1 }
 0x3c5   :  { %v1812_v38 = vpop.f32.mrf.mxu1 }
 0x3c7   :  { %1297 = vperm.xlu1 %1884, %v1070_v50   ;;  %v2676_v58 = vpop.f32.mrf.mxu1 }
 0x3c9   :  { %v1815_v47 = vpop.f32.mrf.mxu1 }
 0x3cb   :  { %1292 = vperm.xlu1 %1884, %v1069_v39   ;;  %v1236_v3 = vpop.f32.mrf.mxu1 }
 0x3cd   :  { %v1818_v50 = vpop.f32.mrf.mxu1 }
 0x3cf   :  { %1287 = vperm.xlu1 %1884, %v1068_v54   ;;  %v1246_v24 = vpop.f32.mrf.mxu1 }
 0x3d1   :  { %v1821_v11 = vpop.f32.mrf.mxu1 }
 0x3d3   :  { %1282 = vperm.xlu1 %1884, %v1067_v1   ;;  %v1256_v0 = vpop.f32.mrf.mxu1 }
 0x3d5   :  { %v1824_v49 = vpop.f32.mrf.mxu1 }
 0x3d7   :  { %1277 = vperm.xlu1 %1884, %v1066_v10   ;;  %v1266_v23 = vpop.f32.mrf.mxu1 }
 0x3db   :  { %1373 = vperm.xlu1 %1884, %v1114_v30  }
 0x3fa   :  { %v2666_v19 = vpop.permute.xlu0 %1418 }
 0x3fe   :  { %v2672_v41 = vpop.permute.xlu0 %1413 }
 0x402   :  { %v1429_v32 = vpop.permute.xlu0 %1428 }
 0x407   :  { %v1424_v44 = vpop.permute.xlu0 %1423 }
 0x40b   :  { %v1439_v22 = vpop.permute.xlu0 %1438 }
 0x412   :  { %v1348_v33 = vpop.permute.xlu0 %1347 }
 0x413   :  { %v1369_v34 = vmul.f32 %v1348_v33, %v1266_v23 }
 0x416   :  { %v1313_v36 = vpop.permute.xlu1 %1312  ;;  %v1434_v62 = vpop.permute.xlu0 %1433 }
 0x41a   :  { %v1323_v55 = vpop.permute.xlu1 %1322  ;;  %v1444_v14 = vpop.permute.xlu0 %1443 }
 0x41b   :  { %v1465_v59 = vadd.f32 %v1444_v14, %v1369_v34  ;;  %v1364_v31 = vmul.f32 %v1815_v47, %v1323_v55 }
 0x41d   :  { %v1497_v1 = vmul.f32 0.2, %v1465_v59  ;;  %vm1481_vm4 = vcmp.ge.f32.partialorder %v1465_v59, 0.0  ;;  %v1460_v29 = vadd.f32 %v2666_v19, %v1364_v31 }
 0x41e   :  { %v1318_v27 = vpop.permute.xlu1 %1317  ;;  %v1409_v51 = vpop.permute.xlu0 %1408 }
 0x41f   :  { %v1363_v28 = vmul.f32 %v1318_v27, %v1236_v3  ;;  %v1513_v61 = vsel %vm1481_vm4, %v1465_v59, %v1497_v1  ;;  %v1492_v55 = vmul.f32 0.2, %v1460_v29  ;;  %vm1476_vm9 = vcmp.ge.f32.partialorder %v1460_v29, 0.0 }
 0x421   :  { %v1459_v47 = vadd.f32 %v2672_v41, %v1363_v28  ;;  %v1508_v14 = vsel %vm1476_vm9, %v1460_v29, %v1492_v55 }
 0x422   :  { %v1333_v48 = vpop.permute.xlu1 %1332  ;;  %v1404_v54 = vpop.permute.xlu0 %1403 }
 0x423   :  { %v1366_v25 = vmul.f32 %v1818_v50, %v1333_v48  ;;  %v1491_v41 = vmul.f32 0.2, %v1459_v47  ;;  %vm1475_vm10 = vcmp.ge.f32.partialorder %v1459_v47, 0.0 }
 0x425   :  { %v1462_v4 = vadd.f32 %v1429_v32, %v1366_v25  ;;  %v1362_v32 = vmul.f32 %v1812_v38, %v1313_v36 }
 0x426   :  { %v1328_v39 = vpop.permute.xlu1 %1327  ;;  %v1399_v7 = vpop.permute.xlu0 %1398 }
 0x427   :  { %v1365_v52 = vmul.f32 %v1328_v39, %v1246_v24  ;;  %v1494_v42 = vmul.f32 0.2, %v1462_v4  ;;  %vm1478_vm7 = vcmp.ge.f32.partialorder %v1462_v4, 0.0  ;;  %v1458_v19 = vadd.f32 %v1409_v51, %v1362_v32 }
 0x429   :  { %v1461_v40 = vadd.f32 %v1424_v44, %v1365_v52  ;;  %v1510_v38 = vsel %vm1478_vm7, %v1462_v4, %v1494_v42  ;;  %v1490_v48 = vmul.f32 0.2, %v1458_v19  ;;  %vm1474_vm11 = vcmp.ge.f32.partialorder %v1458_v19, 0.0  ;;  %v1515_v4 = vld [vmem:[%s2721_s9] sm:$0x1]  ;;  %s1967_s9 = smov [#allocation4]  }
 0x42a   :  { %v1343_v56 = vpop.permute.xlu1 %1342  ;;  %v1394_v60 = vpop.permute.xlu0 %1393  ;;  %s1639_s23 = sshll.u32 %s1967_s9, 4  ;;  %s1640_s23 = int_to_ptr.vmem [resolvable:$true] %s1639_s23 }
 0x42b   :  { %v1368_v35 = vmul.f32 %v1821_v11, %v1343_v56  ;;  %v1493_v44 = vmul.f32 0.2, %v1461_v40  ;;  %vm1477_vm8 = vcmp.ge.f32.partialorder %v1461_v40, 0.0  ;;  %s1940_s24 = scalar_lea.vmem %s1640_s23, 16  ;;  %s1944_s25 = scalar_lea.vmem %s1640_s23, 32 }
 0x42c   :  { %p1941_p0 = scmp.ne.s32.totalorder %s1640_s23, %s1940_s24  ;;  %p1945_p1 = scmp.lt.s32.totalorder %s1640_s23, %s1640_s23 }
 0x42d   :  { %v1464_v46 = vadd.f32 %v1439_v22, %v1368_v35  ;;  %v1509_v24 = vsel %vm1477_vm8, %v1461_v40, %v1493_v44  ;;  %p1946_p2 = scmp.lt.s32.totalorder %s1944_s25, %s1940_s24 }
 0x42e   :  { %v1338_v26 = vpop.permute.xlu1 %1337  ;;  %v1389_v36 = vpop.permute.xlu0 %1388 }
 0x42f   :  { %v1367_v57 = vmul.f32 %v1338_v26, %v1256_v0  ;;  %v1496_v17 = vmul.f32 0.2, %v1464_v46  ;;  %vm1480_vm5 = vcmp.ge.f32.partialorder %v1464_v46, 0.0  ;;  %p1947_p3 = por %p1946_p2, %p1945_p1 }
 0x431   :  { %v1463_v16 = vadd.f32 %v1434_v62, %v1367_v57  ;;  %v1512_v30 = vsel %vm1480_vm5, %v1464_v46, %v1496_v17  ;;  %p1948_p4 = pnand %p1947_p3, %p1941_p0 }
 0x432   :  { %v1353_v37 = vpop.permute.xlu1 %1352  ;;  %v1384_v56 = vpop.permute.xlu0 %1383 }
 0x433   :  { %v1370_v18 = vmul.f32 %v1824_v49, %v1353_v37  ;;  %v1495_v8 = vmul.f32 0.2, %v1463_v16  ;;  %vm1479_vm6 = vcmp.ge.f32.partialorder %v1463_v16, 0.0 }
 0x435   :  { %v1511_v3 = vsel %vm1479_vm6, %v1463_v16, %v1495_v8 }
 0x436   :  { %v1449_v12 = vpop.permute.xlu1 %1448 }
 0x437   :  { %v1466_v63 = vadd.f32 %v1449_v12, %v1370_v18 }
 0x439   :  { %vm1482_vm3 = vcmp.ge.f32.partialorder %v1466_v63, 0.0  ;;  %v1498_v2 = vmul.f32 0.2, %v1466_v63 }
 0x43a   :  { %v1308_v6 = vpop.permute.xlu1 %1307 }
 0x43b   :  { %v1514_v5 = vsel %vm1482_vm3, %v1466_v63, %v1498_v2  ;;  %v1361_v22 = vmul.f32 %v1308_v6, %v2676_v58  ;;  %vm1586_vm3 = vcmask 57344  }
 0x43c   :  { %1826 = vmatpush3.msra.mxu0 %v1514_v5 }
 0x43d   :  { %1827 = vmatprep.subr.mxu0 %v1965_v9  ;;  %v1457_v27 = vadd.f32 %v1404_v54, %v1361_v22 }
 0x43e   :  { %v1303_v10 = vpop.permute.xlu1 %1302  ;;  %1828 = vmatpush3.msra.mxu0 %v1513_v61 }
 0x43f   :  { %1829 = vmatprep.subr.mxu0 %v1965_v9  ;;  %v1360_v50 = vmul.f32 %v2670_v43, %v1303_v10  ;;  %v1489_v39 = vmul.f32 0.2, %v1457_v27  ;;  %vm1473_vm12 = vcmp.ge.f32.partialorder %v1457_v27, 0.0 }
 0x440   :  { %1830 = vmatpush3.msra.mxu0 %v1512_v30 }
 0x441   :  { %1831 = vmatprep.subr.mxu0 %v1965_v9  ;;  %v1456_v11 = vadd.f32 %v1399_v7, %v1360_v50  ;;  %v1505_v37 = vsel %vm1473_vm12, %v1457_v27, %v1489_v39 }
 0x442   :  { %v1298_v33 = vpop.permute.xlu1 %1297  ;;  %1832 = vmatpush3.msra.mxu0 %v1511_v3  ;;  %v1604_v3 = vld [vmem:[#allocation3] sm:$0x1] }
 0x443   :  { %1833 = vmatprep.subr.mxu0 %v1965_v9  ;;  %v1359_v58 = vmul.f32 %v1298_v33, %v2674_v45  ;;  %v1507_v45 = vsel %vm1475_vm10, %v1459_v47, %v1491_v41  ;;  %v1488_v51 = vmul.f32 0.2, %v1456_v11  ;;  %vm1472_vm13 = vcmp.ge.f32.partialorder %v1456_v11, 0.0  ;;  %v1602_v47 = vld [vmem:[#allocation2] sm:$0x1] }
 0x444   :  { %1834 = vmatpush3.msra.mxu0 %v1510_v38 }
 0x445   :  { %1835 = vmatprep.subr.mxu0 %v1965_v9  ;;  %v1455_v0 = vadd.f32 %v1394_v60, %v1359_v58  ;;  %v1504_v18 = vsel %vm1472_vm13, %v1456_v11, %v1488_v51 }
 0x446   :  { %v1293_v62 = vpop.permute.xlu1 %1292  ;;  %1836 = vmatpush3.msra.mxu0 %v1509_v24 }
 0x447   :  { %v1358_v43 = vmul.f32 %v2664_v15, %v1293_v62  ;;  %1837 = vmatprep.subr.mxu0 %v1965_v9  ;;  %v1506_v15 = vsel %vm1474_vm11, %v1458_v19, %v1490_v48  ;;  %v1487_v34 = vmul.f32 0.2, %v1455_v0  ;;  %vm1471_vm14 = vcmp.ge.f32.partialorder %v1455_v0, 0.0 }
 0x448   :  { %1838 = vmatpush3.msra.mxu0 %v1508_v14 }
 0x449   :  { %1839 = vmatprep.subr.mxu0 %v1965_v9  ;;  %v1454_v26 = vadd.f32 %v1389_v36, %v1358_v43  ;;  %v1503_v46 = vsel %vm1471_vm14, %v1455_v0, %v1487_v34 }
 0x44a   :  { %v1288_v49 = vpop.permute.xlu1 %1287  ;;  %1840 = vmatpush3.msra.mxu0 %v1507_v45 }
 0x44b   :  { %v1357_v23 = vmul.f32 %v1288_v49, %v2668_v20  ;;  %1841 = vmatprep.subr.mxu0 %v1965_v9  ;;  %v1486_v59 = vmul.f32 0.2, %v1454_v26  ;;  %v1379_v20 = vpop.permute.xlu0 %1378  ;;  %vm1470_vm15 = vcmp.ge.f32.partialorder %v1454_v26, 0.0 }
 0x44c   :  { %1842 = vmatpush3.msra.mxu0 %v1506_v15 }
 0x44d   :  { %v1453_v54 = vadd.f32 %v1384_v56, %v1357_v23  ;;  %1843 = vmatprep.subr.mxu0 %v1965_v9  ;;  %v1502_v7 = vsel %vm1470_vm15, %v1454_v26, %v1486_v59 }
 0x44e   :  { %v1283_v35 = vpop.permute.xlu1 %1282  ;;  %1844 = vmatpush3.msra.mxu0 %v1505_v37 }
 0x44f   :  { %v1356_v57 = vmul.f32 %v2660_v53, %v1283_v35  ;;  %1845 = vmatprep.subr.mxu0 %v1965_v9  ;;  %v1485_v12 = vmul.f32 0.2, %v1453_v54  ;;  %vm1469_vm1 = vcmp.ge.f32.partialorder %v1453_v54, 0.0 }
 0x450   :  { %1846 = vmatpush3.msra.mxu0 %v1504_v18 }
 0x451   :  { %v1452_v25 = vadd.f32 %v1379_v20, %v1356_v57  ;;  %1847 = vmatprep.subr.mxu0 %v1965_v9  ;;  %v1501_v52 = vsel %vm1469_vm1, %v1453_v54, %v1485_v12 }
 0x452   :  { %v1278_v63 = vpop.permute.xlu1 %1277  ;;  %1848 = vmatpush3.msra.mxu0 %v1503_v46 }
 0x453   :  { %v1484_v1 = vmul.f32 0.2, %v1452_v25  ;;  %1849 = vmatprep.subr.mxu0 %v1965_v9  ;;  %vm1468_vm2 = vcmp.ge.f32.partialorder %v1452_v25, 0.0  ;;  %v1355_v53 = vmul.f32 %v1278_v63, %v2662_v13 }
 0x454   :  { %1850 = vmatpush3.msra.mxu0 %v1502_v7 }
 0x455   :  { %1851 = vmatprep.subr.mxu0 %v1965_v9  ;;  %v1500_v6 = vsel %vm1468_vm2, %v1452_v25, %v1484_v1 }
 0x456   :  { %v1374_v16 = vpop.permute.xlu1 %1373  ;;  %1852 = vmatpush3.msra.mxu0 %v1501_v52 }
 0x457   :  { %v1451_v2 = vadd.f32 %v1374_v16, %v1355_v53  ;;  %1853 = vmatprep.subr.mxu0 %v1965_v9 }
 0x458   :  { %1854 = vmatpush3.msra.mxu0 %v1500_v6 }
 0x459   :  { %vm1467_vm0 = vcmp.ge.f32.partialorder %v1451_v2, 0.0  ;;  %v1483_v31 = vmul.f32 0.2, %v1451_v2  ;;  %1855 = vmatprep.subr.mxu0 %v1965_v9 }
 0x45b   :  { %v1499_v17 = vsel %vm1467_vm0, %v1451_v2, %v1483_v31 }
 0x45c   :  { %1856 = vmatpush3.msra.mxu0 %v1499_v17 }
 0x45d   :  { %1858 = vmatmul.mubr.f32.vlgmr.msra.gmra.mxu0 %v1515_v4 }
 0x51d   :  { %v1582_v13 = vpop.f32.mrf.mxu0 }
 0x51e   :  { %v1590_v5 = vmul.f32 %v1582_v13, %v1582_v13  ;;  %v1587_v28 = vsel %vm1586_vm3, %v1582_v13, 0.0 }
 0x51f   :  { %1588 = vadd.xlane.f32.xlu0 %v1587_v28  ;;  %v1859_v40 = vpop.f32.mrf.mxu0 }
 0x520   :  { %v1591_v8 = vsel %vm1586_vm3, %v1590_v5, 0.0 }
 0x521   :  { %1592 = vadd.xlane.f32.xlu1 %v1591_v8 }
 0x5a8   :  { %v1589_v61 = vpop.xlane.xlu0 %1588 }
 0x5a9   :  { %v1595_v60 = vmul.f32 0.125, %v1589_v61 }
 0x5aa   :  { %v1593_v9 = vpop.xlane.xlu1 %1592 }
 0x5ab   :  { %v1597_v10 = vmul.f32 %v1595_v60, %v1595_v60  ;;  %v1596_v29 = vmul.f32 0.125, %v1593_v9 }
 0x5ad   :  { %v1598_v42 = vsub.f32 %v1596_v29, %v1597_v10 }
 0x5af   :  { %v1599_v30 = vmax.f32 %v1598_v42, 0.0 }
 0x5b1   :  { %v1600_v32 = vadd.f32 1e-05, %v1599_v30 }
 0x5b3   :  { %1934 = vrsqrt.f32 %v1600_v32 }
 0x5c0   :  { %v1935_v44 = vpop.eup %1934 }
 0x5c1   :  { %v1603_v22 = vmul.f32 %v1935_v44, %v1602_v47 }
 0x5c3   :  { %1609 = vperm.xlu0 %1885, %v1603_v22   ;;  %v1605_v33 = vmul.f32 %v1603_v22, %v1595_v60 }
 0x5c5   :  { %v1606_v55 = vsub.f32 %v1604_v3, %v1605_v33 }
 0x5c7   :  { %1615 = vperm.xlu1 %1884, %v1606_v55  }
 0x63e   :  { %v1610_v19 = vpop.permute.xlu0 %1609 }
 0x63f   :  { %v1612_v38 = vmul.f32 %v1610_v19, %v1582_v13 }
 0x642   :  { %v1616_v50 = vpop.permute.xlu1 %1615 }
 0x643   :  { %v1621_v36 = vrot.slane %v1616_v50, %v2067_v21 }
 0x645   :  { %v1622_v41 = vadd.f32 %v1621_v36, %v1612_v38 }
 0x647   :  { %vm1623_vm4 = vcmp.ge.f32.partialorder %v1622_v41, 0.0  ;;  %v1624_v27 = vmul.f32 0.2, %v1622_v41 }
 0x649   :  { %v1625_v58 = vsel %vm1623_vm4, %v1622_v41, %v1624_v27 }
 0x64a   :  { %v1679_v24 = vmul.f32 -1.442695, %v1625_v58 }
 0x64c   :  { %1936 = vpow2.f32 %v1679_v24 }
 0x659   :  { %v1937_v62 = vpop.eup %1936 }
 0x65a   :  { %v1629_v48 = vadd.f32 1.0, %v1937_v62 }
 0x65c   :  { %1938 = vrcp.f32 %v1629_v48 }
 0x669   :  { %v1939_v11 = vpop.eup %1938 }
 0x66a   :  { %1632 = vst.msk [vmem:[#allocation4] sm:$0x1] %vm1586_vm3, %v1939_v11 }
 0x66b   :  { %1951 = shalt.err (!%p1948_p4)
}
 0x66c   :  { %1642 = dma.vmem_to_hbm [thread:$0]  %s1640_s23, 16, %s2723_s12, [#allocation5]  }
 0x66d   :  { %1960 = dma.done.wait [#allocation5], 16  }
 0x66e   :  { %1961 = vsyncadd [#allocation5], 4294967280 }
 0x66f   :  { %1646 = vsyncpa [#allocation5], 1 }

</bundles_post_ra>
